<compile_context>
chip_gen: v7x
topology: tpu7x:2x2x1
jax: 0.10.0
libtpu: 0.0.40
codegen_flags: <defaults>
</compile_context>

<pallas_src>
import jax
import jax.numpy as jnp
from jax.experimental import pallas as pl
from jax.experimental.pallas import tpu as pltpu

PATCH = 14                      # DINO patch size
FEAT_SIZE = 768                 # Backbone.eDINO_B
EMBED_SIZE = 32
GRID_SIZE = (28, 28)            # input image H, W  (grid_size in the module)
SPATIAL_RES = (GRID_SIZE[0] // PATCH, GRID_SIZE[1] // PATCH)   # (2, 2)
SPATIAL_SZ = SPATIAL_RES[0] * SPATIAL_RES[1]                   # 4

IMAGENET_MEAN = jnp.array([0.485, 0.456, 0.406], dtype=jnp.float32)
IMAGENET_STD = jnp.array([0.229, 0.224, 0.225], dtype=jnp.float32)


# ------------------------------------------------------------------
# Single fused kernel:
#   tokens = patches @ W_pe' + b_pe'        (normalization folded into W/b)
#   y      = sum_p tokens[p-block] @ W_fc3[p] + b_fc
#   out    = y / max(||y||_2, 1e-12)         (F.normalize, p=2, dim=1)
#
# Token rows are ordered (spatial p, batch b) so the fc contraction uses only
# contiguous static slices of the token scratch — no in-kernel reshape or
# transpose is needed.
# ------------------------------------------------------------------
def _aero_fused_kernel(p_ref, wpe_ref, bpe_ref, wfc_ref, bfc_ref,
                       o_ref, tok_ref):
    B, E = o_ref.shape
    P = wfc_ref.shape[0]

    # Backbone stand-in: patch-embed projection (ImageNet normalize folded in).
    # TODO(synk): the full DINO-B transformer backbone (attention blocks,
    # pos-embed) has no clean Pallas equivalent here; only the patch-embed
    # projection is kernelized.
    tok_ref[...] = (
        jnp.dot(p_ref[...], wpe_ref[...], preferred_element_type=jnp.float32)
        + bpe_ref[...]
    )

    # fc_a over the PyTorch NCHW-flattened features.  The weight was
    # pre-permuted at init to (P, FEAT, E), so we accumulate one small MXU
    # matmul per spatial position (P = 4, static unroll).
    y = jnp.broadcast_to(bfc_ref[...], (B, E)).astype(jnp.float32)
    for p in range(P):
        tok_p = tok_ref[pl.ds(p * B, B), :].astype(wfc_ref.dtype)
        y = y + jnp.dot(tok_p, wfc_ref[p],
                        preferred_element_type=jnp.float32)

    # L2 normalization (F.normalize eps = 1e-12); exact reciprocal keeps the
    # unit-norm property to f32 precision.
    norm = jnp.sqrt(jnp.sum(y * y, axis=1, keepdims=True))
    o_ref[...] = y * pl.reciprocal(jnp.maximum(norm, 1e-12))


# ------------------------------------------------------------------
# One-time parameter preparation (host side, outside the hot path):
#   * fold (x - mean) / std into the patch-embed weight/bias
#   * zero-pad the patch K dim to a multiple of 128
#   * permute fc_a weight rows from PyTorch flatten order (f * P + p) to
#     (P, FEAT, E) so it matches the kernel's token row order
#   * cast matmul weights to bf16 (f32 accumulation stays in the kernel)
# ------------------------------------------------------------------
def prepare_params(w_pe, b_pe_proj, w_fc_t, b_fc):
    k_pe, feat = w_pe.shape
    kfc, emb = w_fc_t.shape
    spatial = kfc // feat

    scale_k = jnp.repeat(1.0 / IMAGENET_STD, PATCH * PATCH)          # (588,)
    shift_k = jnp.repeat(IMAGENET_MEAN / IMAGENET_STD, PATCH * PATCH)

    w_pe_fold = w_pe * scale_k[:, None]                              # (588, F)
    b_pe = (b_pe_proj - shift_k @ w_pe).reshape(1, feat)             # (1, F)

    kp_pad = ((k_pe + 127) // 128) * 128                             # 588 -> 640
    w_pe_fold = jnp.pad(w_pe_fold, ((0, kp_pad - k_pe), (0, 0)))
    w_pe_fold = w_pe_fold.astype(jnp.bfloat16)

    # PyTorch flatten of (B, F, hp, wp) uses input index f * P + p.
    w_fc3 = w_fc_t.reshape(feat, spatial, emb)
    w_fc3 = jnp.transpose(w_fc3, (1, 0, 2)).astype(jnp.bfloat16)     # (P, F, E)

    return (w_pe_fold, b_pe.astype(jnp.float32), w_fc3,
            b_fc.reshape(1, emb).astype(jnp.float32))


# ------------------------------------------------------------------
# Full forward pass (AeroBEVNet.forward) — one pallas_call.
# ------------------------------------------------------------------
@jax.jit
def aero_bev_net_forward(x, w_pe_fold, b_pe, w_fc3, b_fc):
    B, C, H, W = x.shape
    hp, wp = H // PATCH, W // PATCH
    P = hp * wp
    kp_pad, feat = w_pe_fold.shape
    emb = w_fc3.shape[2]

    # Patch extraction with rows ordered (spatial p, batch b) so the kernel
    # only needs contiguous static slices per spatial position.
    patches = x.astype(jnp.float32).reshape(B, C, hp, PATCH, wp, PATCH)
    patches = jnp.transpose(patches, (2, 4, 0, 1, 3, 5))   # (hp, wp, B, C, 14, 14)
    patches = patches.reshape(P * B, C * PATCH * PATCH)
    patches = jnp.pad(patches, ((0, 0), (0, kp_pad - patches.shape[1])))
    patches = patches.astype(jnp.bfloat16)

    return pl.pallas_call(
        _aero_fused_kernel,
        out_shape=jax.ShapeDtypeStruct((B, emb), jnp.float32),
        grid=(1,),
        in_specs=[
            pl.BlockSpec((P * B, kp_pad), lambda i: (0, 0)),
            pl.BlockSpec((kp_pad, feat), lambda i: (0, 0)),
            pl.BlockSpec((1, feat), lambda i: (0, 0)),
            pl.BlockSpec((P, feat, emb), lambda i: (0, 0, 0)),
            pl.BlockSpec((1, emb), lambda i: (0, 0)),
        ],
        out_specs=pl.BlockSpec((B, emb), lambda i: (0, 0)),
        scratch_shapes=[pltpu.VMEM((P * B, feat), jnp.float32)],
        compiler_params=pltpu.CompilerParams(
            dimension_semantics=("arbitrary",)),
    )(patches, w_pe_fold, b_pe, w_fc3, b_fc)


if __name__ == "__main__":
    key = jax.random.PRNGKey(0)
    k_x, k_pe, k_pb, k_w, k_b = jax.random.split(key, 5)

    B, C, H, W = 2, 3, GRID_SIZE[0], GRID_SIZE[1]
    x = jax.random.uniform(k_x, (B, C, H, W), jnp.float32)

    # deterministic synthetic parameters (shapes from the module __init__)
    K_pe = C * PATCH * PATCH                                   # 588
    w_pe = jax.random.normal(k_pe, (K_pe, FEAT_SIZE), jnp.float32) * 0.02
    b_pe_proj = jax.random.normal(k_pb, (FEAT_SIZE,), jnp.float32) * 0.02
    K_fc = FEAT_SIZE * SPATIAL_SZ                              # 3072
    # nn.Linear stores weight (E, K); we use its transpose for x @ W^T
    w_fc_t = jax.random.normal(k_w, (K_fc, EMBED_SIZE), jnp.float32) * 0.02
    b_fc = jax.random.normal(k_b, (EMBED_SIZE,), jnp.float32) * 0.02

    params = prepare_params(w_pe, b_pe_proj, w_fc_t, b_fc)

    out = aero_bev_net_forward(x, *params)
    out = jax.block_until_ready(out)

    assert out.shape == (B, EMBED_SIZE)
    # embeddings are L2-normalized rows
    norms = jnp.linalg.norm(out, axis=1)
    assert jnp.allclose(norms, 1.0, atol=1e-4)
    print("KERNEL_OK")
</pallas_src>

<mosaic_0001>
module attributes {stable_mosaic.version = 11 : i64} {
  func.func @_aero_fused_kernel(%arg0: i32, %arg1: memref<8x640xbf16, #tpu.memory_space<vmem>>, %arg2: memref<640x768xbf16, #tpu.memory_space<vmem>>, %arg3: memref<1x768xf32, #tpu.memory_space<vmem>>, %arg4: memref<4x768x32xbf16, #tpu.memory_space<vmem>>, %arg5: memref<1x32xf32, #tpu.memory_space<vmem>>, %arg6: memref<2x32xf32, #tpu.memory_space<vmem>>, %arg7: memref<8x768xf32, #tpu.memory_space<vmem>>) attributes {dimension_semantics = [#tpu.dimension_semantics<arbitrary>], iteration_bounds = array<i64: 1>, scalar_prefetch = 0 : i64, scratch_operands = 1 : i64, tpu.core_type = #tpu.core_type<tc>, window_params = [{pipeline_mode = #tpu.pipeline_mode<synchronous>, transform_indices = @transform_0, window_bounds = array<i64: 8, 640>}, {pipeline_mode = #tpu.pipeline_mode<synchronous>, transform_indices = @transform_1, window_bounds = array<i64: 640, 768>}, {pipeline_mode = #tpu.pipeline_mode<synchronous>, transform_indices = @transform_2, window_bounds = array<i64: 1, 768>}, {pipeline_mode = #tpu.pipeline_mode<synchronous>, transform_indices = @transform_3, window_bounds = array<i64: 4, 768, 32>}, {pipeline_mode = #tpu.pipeline_mode<synchronous>, transform_indices = @transform_4, window_bounds = array<i64: 1, 32>}, {pipeline_mode = #tpu.pipeline_mode<synchronous>, transform_indices = @transform_5, window_bounds = array<i64: 2, 32>}]} {
    %c0 = arith.constant 0 : index
    %c0_0 = arith.constant 0 : index
    %0 = vector.load %arg1[%c0, %c0_0] : memref<8x640xbf16, #tpu.memory_space<vmem>>, vector<8x640xbf16>
    %c0_1 = arith.constant 0 : index
    %c0_2 = arith.constant 0 : index
    %1 = vector.load %arg2[%c0_1, %c0_2] : memref<640x768xbf16, #tpu.memory_space<vmem>>, vector<640x768xbf16>
    %cst = arith.constant dense<0.000000e+00> : vector<8x768xf32>
    %2 = tpu.matmul %0, %1, %cst {dimension_numbers = #tpu.dot_dimension_numbers<[1], [0], [0], [1], [0, 0, 1, 1], [], []>} : vector<8x640xbf16>, vector<640x768xbf16>, vector<8x768xf32> -> vector<8x768xf32>
    %c0_3 = arith.constant 0 : index
    %c0_4 = arith.constant 0 : index
    %3 = vector.load %arg3[%c0_3, %c0_4] : memref<1x768xf32, #tpu.memory_space<vmem>>, vector<1x768xf32>
    %4 = vector.broadcast %3 : vector<1x768xf32> to vector<8x768xf32>
    %5 = arith.addf %2, %4 : vector<8x768xf32>
    %c0_5 = arith.constant 0 : index
    %c0_6 = arith.constant 0 : index
    %6 = vector.load %arg7[%c0_5, %c0_6] : memref<8x768xf32, #tpu.memory_space<vmem>>, vector<8x768xf32>
    tpu.vector_store %arg7[%c0_5, %c0_6], %5 {strides = array<i32>} : memref<8x768xf32, #tpu.memory_space<vmem>>, vector<8x768xf32>,
    %c0_7 = arith.constant 0 : index
    %c0_8 = arith.constant 0 : index
    %7 = vector.load %arg5[%c0_7, %c0_8] : memref<1x32xf32, #tpu.memory_space<vmem>>, vector<1x32xf32>
    %8 = vector.shape_cast %7 : vector<1x32xf32> to vector<1x32xf32>
    %9 = vector.broadcast %8 : vector<1x32xf32> to vector<2x32xf32>
    %c0_9 = arith.constant 0 : index
    %c0_10 = arith.constant 0 : index
    %10 = vector.load %arg7[%c0_9, %c0_10] : memref<8x768xf32, #tpu.memory_space<vmem>>, vector<2x768xf32>
    %11 = arith.truncf %10 : vector<2x768xf32> to vector<2x768xbf16>
    %c0_11 = arith.constant 0 : index
    %c0_12 = arith.constant 0 : index
    %c0_13 = arith.constant 0 : index
    %12 = vector.load %arg4[%c0_11, %c0_12, %c0_13] : memref<4x768x32xbf16, #tpu.memory_space<vmem>>, vector<1x768x32xbf16>
    %13 = vector.shape_cast %12 : vector<1x768x32xbf16> to vector<768x32xbf16>
    %cst_14 = arith.constant dense<0.000000e+00> : vector<2x32xf32>
    %14 = tpu.matmul %11, %13, %cst_14 {dimension_numbers = #tpu.dot_dimension_numbers<[1], [0], [0], [1], [0, 0, 1, 1], [], []>} : vector<2x768xbf16>, vector<768x32xbf16>, vector<2x32xf32> -> vector<2x32xf32>
    %15 = arith.addf %9, %14 : vector<2x32xf32>
    %c2 = arith.constant 2 : index
    %c0_15 = arith.constant 0 : index
    %16 = vector.load %arg7[%c2, %c0_15] : memref<8x768xf32, #tpu.memory_space<vmem>>, vector<2x768xf32>
    %17 = arith.truncf %16 : vector<2x768xf32> to vector<2x768xbf16>
    %c1 = arith.constant 1 : index
    %c0_16 = arith.constant 0 : index
    %c0_17 = arith.constant 0 : index
    %18 = vector.load %arg4[%c1, %c0_16, %c0_17] : memref<4x768x32xbf16, #tpu.memory_space<vmem>>, vector<1x768x32xbf16>
    %19 = vector.shape_cast %18 : vector<1x768x32xbf16> to vector<768x32xbf16>
    %cst_18 = arith.constant dense<0.000000e+00> : vector<2x32xf32>
    %20 = tpu.matmul %17, %19, %cst_18 {dimension_numbers = #tpu.dot_dimension_numbers<[1], [0], [0], [1], [0, 0, 1, 1], [], []>} : vector<2x768xbf16>, vector<768x32xbf16>, vector<2x32xf32> -> vector<2x32xf32>
    %21 = arith.addf %15, %20 : vector<2x32xf32>
    %c4 = arith.constant 4 : index
    %c0_19 = arith.constant 0 : index
    %22 = vector.load %arg7[%c4, %c0_19] : memref<8x768xf32, #tpu.memory_space<vmem>>, vector<2x768xf32>
    %23 = arith.truncf %22 : vector<2x768xf32> to vector<2x768xbf16>
    %c2_20 = arith.constant 2 : index
    %c0_21 = arith.constant 0 : index
    %c0_22 = arith.constant 0 : index
    %24 = vector.load %arg4[%c2_20, %c0_21, %c0_22] : memref<4x768x32xbf16, #tpu.memory_space<vmem>>, vector<1x768x32xbf16>
    %25 = vector.shape_cast %24 : vector<1x768x32xbf16> to vector<768x32xbf16>
    %cst_23 = arith.constant dense<0.000000e+00> : vector<2x32xf32>
    %26 = tpu.matmul %23, %25, %cst_23 {dimension_numbers = #tpu.dot_dimension_numbers<[1], [0], [0], [1], [0, 0, 1, 1], [], []>} : vector<2x768xbf16>, vector<768x32xbf16>, vector<2x32xf32> -> vector<2x32xf32>
    %27 = arith.addf %21, %26 : vector<2x32xf32>
    %c6 = arith.constant 6 : index
    %c0_24 = arith.constant 0 : index
    %28 = vector.load %arg7[%c6, %c0_24] : memref<8x768xf32, #tpu.memory_space<vmem>>, vector<2x768xf32>
    %29 = arith.truncf %28 : vector<2x768xf32> to vector<2x768xbf16>
    %c3 = arith.constant 3 : index
    %c0_25 = arith.constant 0 : index
    %c0_26 = arith.constant 0 : index
    %30 = vector.load %arg4[%c3, %c0_25, %c0_26] : memref<4x768x32xbf16, #tpu.memory_space<vmem>>, vector<1x768x32xbf16>
    %31 = vector.shape_cast %30 : vector<1x768x32xbf16> to vector<768x32xbf16>
    %cst_27 = arith.constant dense<0.000000e+00> : vector<2x32xf32>
    %32 = tpu.matmul %29, %31, %cst_27 {dimension_numbers = #tpu.dot_dimension_numbers<[1], [0], [0], [1], [0, 0, 1, 1], [], []>} : vector<2x768xbf16>, vector<768x32xbf16>, vector<2x32xf32> -> vector<2x32xf32>
    %33 = arith.addf %27, %32 : vector<2x32xf32>
    %34 = arith.mulf %33, %33 : vector<2x32xf32>
    %cst_28 = arith.constant dense<0.000000e+00> : vector<2xf32>
    %35 = vector.multi_reduction <add>, %34, %cst_28 [1] : vector<2x32xf32> to vector<2xf32>
    %36 = vector.shape_cast %35 : vector<2xf32> to vector<2x1xf32>
    %37 = math.sqrt %36 : vector<2x1xf32>
    %cst_29 = arith.constant 9.99999996E-13 : f32
    %38 = vector.broadcast %cst_29 : f32 to vector<2x1xf32>
    %39 = arith.maximumf %37, %38 : vector<2x1xf32>
    %40 = tpu.reciprocal %39 : vector<2x1xf32> -> vector<2x1xf32>
    %41 = vector.broadcast %40 : vector<2x1xf32> to vector<2x32xf32>
    %42 = arith.mulf %33, %41 : vector<2x32xf32>
    %c0_30 = arith.constant 0 : index
    %c0_31 = arith.constant 0 : index
    %43 = vector.load %arg6[%c0_30, %c0_31] : memref<2x32xf32, #tpu.memory_space<vmem>>, vector<2x32xf32>
    tpu.vector_store %arg6[%c0_30, %c0_31], %42 {strides = array<i32>} : memref<2x32xf32, #tpu.memory_space<vmem>>, vector<2x32xf32>,
    return
  }
  func.func @transform_0(%arg0: i32) -> (i32, i32) {
    %c0_i32 = arith.constant 0 : i32
    %c0_i32_0 = arith.constant 0 : i32
    %c0_i32_1 = arith.constant 0 : i32
    return %c0_i32, %c0_i32_0 : i32, i32
  }
  func.func @transform_1(%arg0: i32) -> (i32, i32) {
    %c0_i32 = arith.constant 0 : i32
    %c0_i32_0 = arith.constant 0 : i32
    %c0_i32_1 = arith.constant 0 : i32
    return %c0_i32, %c0_i32_0 : i32, i32
  }
  func.func @transform_2(%arg0: i32) -> (i32, i32) {
    %c0_i32 = arith.constant 0 : i32
    %c0_i32_0 = arith.constant 0 : i32
    %c0_i32_1 = arith.constant 0 : i32
    return %c0_i32, %c0_i32_0 : i32, i32
  }
  func.func @transform_3(%arg0: i32) -> (i32, i32, i32) {
    %c0_i32 = arith.constant 0 : i32
    %c0_i32_0 = arith.constant 0 : i32
    %c0_i32_1 = arith.constant 0 : i32
    %c0_i32_2 = arith.constant 0 : i32
    return %c0_i32, %c0_i32_0, %c0_i32_1 : i32, i32, i32
  }
  func.func @transform_4(%arg0: i32) -> (i32, i32) {
    %c0_i32 = arith.constant 0 : i32
    %c0_i32_0 = arith.constant 0 : i32
    %c0_i32_1 = arith.constant 0 : i32
    return %c0_i32, %c0_i32_0 : i32, i32
  }
  func.func @transform_5(%arg0: i32) -> (i32, i32) {
    %c0_i32 = arith.constant 0 : i32
    %c0_i32_0 = arith.constant 0 : i32
    %c0_i32_1 = arith.constant 0 : i32
    return %c0_i32, %c0_i32_0 : i32, i32
  }
}

</mosaic_0001>

<bundles_post_ra>
// kernel: aero_bev_net_forward.1
= control target key start
LH: loop header
LB: loop body
LE: loop exit
PB: predicated region body
PF: predicated region fallthrough
CT: control target
= control target key end

     0   :  { %s7071_s0 = inlined_call_operand.vmem [shape: bf16[8,640], index: 0, kind: input, shape index: {}]   ;;  %s7072_s1 = inlined_call_operand.vmem [shape: bf16[640,768], index: 1, kind: input, shape index: {}]   ;;  %s7073_s2 = inlined_call_operand.vmem [shape: f32[1,768], index: 2, kind: input, shape index: {}]   ;;  %s7074_s3 = inlined_call_operand.vmem [shape: bf16[4,768,32], index: 3, kind: input, shape index: {}]   ;;  %s7075_s4 = inlined_call_operand.vmem [shape: f32[1,32], index: 4, kind: input, shape index: {}]   ;;  %s7076_s5 = inlined_call_operand.hbm [shape: f32[2,32], index: 5, kind: output, shape index: {}]  }
   0x1   :  { %v5074_v0 = vld [vmem:[%s7072_s1 + $0x4] ss:$24 sps:$4 sm:$0xff]   ;;  %v5076_v1 = vld [vmem:[%s7072_s1] ss:$24 sps:$4 sm:$0xff]   ;;  %v5077_v2 = vld [vmem:[%s7072_s1 + $0x34] ss:$24 sps:$4 sm:$0xff]  }
   0x2   :  { %1515 = vmatprep.subr.bf16.mxu0 %v5074_v0  ;;  %v5079_v3 = vld [vmem:[%s7072_s1 + $0x30] ss:$24 sps:$4 sm:$0xff]   ;;  %v5080_v4 = vld [vmem:[%s7072_s1 + $0x64] ss:$24 sps:$4 sm:$0xff]   ;;  %v5082_v5 = vld [vmem:[%s7072_s1 + $0x60] ss:$24 sps:$4 sm:$0xff]  }
   0x3   :  { %1516 = vmatpush1.bf16.msra.mxu0 %v5076_v1  ;;  %v5083_v6 = vld [vmem:[%s7072_s1 + $0x94] ss:$24 sps:$4 sm:$0xff]   ;;  %v5085_v7 = vld [vmem:[%s7072_s1 + $0x90] ss:$24 sps:$4 sm:$0xff]   ;;  %v5086_v10 = vld [vmem:[%s7072_s1 + $0xc4] ss:$24 sps:$4 sm:$0xff]  }
   0x4   :  { %1517 = vmatprep.subr.bf16.mxu0 %v5077_v2  ;;  %v5098_v8 = vld [vmem:[%s7072_s1 + $0xc] ss:$24 sps:$4 sm:$0xff]   ;;  %v5100_v9 = vld [vmem:[%s7072_s1 + $0x8] ss:$24 sps:$4 sm:$0xff]   ;;  %v5104_v11 = vld [vmem:[%s7072_s1 + $0x3c] ss:$24 sps:$4 sm:$0xff]  }
   0x5   :  { %1638 = vmatprep.subr.bf16.mxu1 %v5098_v8  ;;  %v5106_v12 = vld [vmem:[%s7072_s1 + $0x38] ss:$24 sps:$4 sm:$0xff]   ;;  %v5089_v14 = vld [vmem:[%s7072_s1 + $0xf4] ss:$24 sps:$4 sm:$0xff]   ;;  %v5112_v16 = vld [vmem:[%s7072_s1 + $0x68] ss:$24 sps:$4 sm:$0xff]  }
   0x6   :  { %1639 = vmatpush1.bf16.msra.mxu1 %v5100_v9  ;;  %v5088_v13 = vld [vmem:[%s7072_s1 + $0xc0] ss:$24 sps:$4 sm:$0xff]   ;;  %v5110_v15 = vld [vmem:[%s7072_s1 + $0x6c] ss:$24 sps:$4 sm:$0xff]   ;;  %v5091_v17 = vld [vmem:[%s7072_s1 + $0xf0] ss:$24 sps:$4 sm:$0xff]  }
   0x7   :  { %1518 = vmatpush1.bf16.msra.mxu0 %v5079_v3  ;;  %1640 = vmatprep.subr.bf16.mxu1 %v5104_v11  ;;  %v5116_v18 = vld [vmem:[%s7072_s1 + $0x9c] ss:$24 sps:$4 sm:$0xff]   ;;  %v5118_v20 = vld [vmem:[%s7072_s1 + $0x98] ss:$24 sps:$4 sm:$0xff]   ;;  %v5122_v22 = vld [vmem:[%s7072_s1 + $0xcc] ss:$24 sps:$4 sm:$0xff]  }
   0x8   :  { %1519 = vmatprep.subr.bf16.mxu0 %v5080_v4  ;;  %v5092_v19 = vld [vmem:[%s7072_s1 + $0x124] ss:$24 sps:$4 sm:$0xff]   ;;  %v5094_v21 = vld [vmem:[%s7072_s1 + $0x120] ss:$24 sps:$4 sm:$0xff]   ;;  %v5095_v23 = vld [vmem:[%s7072_s1 + $0x154] ss:$24 sps:$4 sm:$0xff]  }
   0x9   :  { %v5124_v24 = vld [vmem:[%s7072_s1 + $0xc8] ss:$24 sps:$4 sm:$0xff]   ;;  %v5128_v26 = vld [vmem:[%s7072_s1 + $0xfc] ss:$24 sps:$4 sm:$0xff]   ;;  %v5130_v28 = vld [vmem:[%s7072_s1 + $0xf8] ss:$24 sps:$4 sm:$0xff]  }
   0xa   :  { %1641 = vmatpush1.bf16.msra.mxu1 %v5106_v12  ;;  %v5097_v25 = vld [vmem:[%s7072_s1 + $0x150] ss:$24 sps:$4 sm:$0xff]   ;;  %v5101_v27 = vld [vmem:[%s7072_s1 + $0x184] ss:$24 sps:$4 sm:$0xff]   ;;  %v5103_v29 = vld [vmem:[%s7072_s1 + $0x180] ss:$24 sps:$4 sm:$0xff]  }
   0xb   :  { %1520 = vmatpush1.bf16.msra.mxu0 %v5082_v5  ;;  %1642 = vmatprep.subr.bf16.mxu1 %v5110_v15  ;;  %v5134_v30 = vld [vmem:[%s7072_s1 + $0x12c] ss:$24 sps:$4 sm:$0xff]   ;;  %v5109_v33 = vld [vmem:[%s7072_s1 + $0x1b0] ss:$24 sps:$4 sm:$0xff]   ;;  %v5140_v36 = vld [vmem:[%s7072_s1 + $0x15c] ss:$24 sps:$4 sm:$0xff]  }
   0xc   :  { %1521 = vmatprep.subr.bf16.mxu0 %v5083_v6  ;;  %v5107_v31 = vld [vmem:[%s7072_s1 + $0x1b4] ss:$24 sps:$4 sm:$0xff]   ;;  %v22_v32 = vld [vmem:[%s7071_s0] sm:$0xff]  ;;  %v5142_v39 = vld [vmem:[%s7072_s1 + $0x158] ss:$24 sps:$4 sm:$0xff]  }
   0xd   :  { %v5136_v34 = vld [vmem:[%s7072_s1 + $0x128] ss:$24 sps:$4 sm:$0xff]   ;;  %v5797_v35 = vcombine.high %v22_v32, %v22_v32  ;;  %v5113_v37 = vld [vmem:[%s7072_s1 + $0x1e4] ss:$24 sps:$4 sm:$0xff]   ;;  %v5119_v41 = vld [vmem:[%s7072_s1 + $0x214] ss:$24 sps:$4 sm:$0xff]   ;;  %v5882_v63 = vcombine.low %v22_v32, %v22_v32 }
   0xe   :  { %1643 = vmatpush1.bf16.msra.mxu1 %v5112_v16  ;;  %v5115_v38 = vld [vmem:[%s7072_s1 + $0x1e0] ss:$24 sps:$4 sm:$0xff]   ;;  %v5146_v40 = vld [vmem:[%s7072_s1 + $0x18c] ss:$24 sps:$4 sm:$0xff]   ;;  %v5121_v42 = vld [vmem:[%s7072_s1 + $0x210] ss:$24 sps:$4 sm:$0xff]  }
   0xf   :  { %1522 = vmatpush1.bf16.msra.mxu0 %v5085_v7  ;;  %1644 = vmatprep.subr.bf16.mxu1 %v5116_v18  ;;  %v5148_v43 = vld [vmem:[%s7072_s1 + $0x188] ss:$24 sps:$4 sm:$0xff]   ;;  %v5154_v44 = vld [vmem:[%s7072_s1 + $0x1bc] ss:$24 sps:$4 sm:$0xff]   ;;  %v5156_v47 = vld [vmem:[%s7072_s1 + $0x1b8] ss:$24 sps:$4 sm:$0xff]  }
  0x10   :  { %1523 = vmatprep.subr.bf16.mxu0 %v5086_v10  ;;  %1547 = vmatprep.mubr.bf16.mxu0 %v5797_v35  ;;  %v5125_v45 = vld [vmem:[%s7072_s1 + $0x244] ss:$24 sps:$4 sm:$0xff]   ;;  %v5127_v46 = vld [vmem:[%s7072_s1 + $0x240] ss:$24 sps:$4 sm:$0xff]   ;;  %v5131_v49 = vld [vmem:[%s7072_s1 + $0x274] ss:$24 sps:$4 sm:$0xff]  }
  0x11   :  { %1670 = vmatprep.mubr.bf16.mxu1 %v5797_v35  ;;  %v5160_v48 = vld [vmem:[%s7072_s1 + $0x1ec] ss:$24 sps:$4 sm:$0xff]   ;;  %v5133_v50 = vld [vmem:[%s7072_s1 + $0x270] ss:$24 sps:$4 sm:$0xff]   ;;  %v5166_v52 = vld [vmem:[%s7072_s1 + $0x21c] ss:$24 sps:$4 sm:$0xff]  }
  0x12   :  { %1645 = vmatpush1.bf16.msra.mxu1 %v5118_v20  ;;  %v5162_v51 = vld [vmem:[%s7072_s1 + $0x1e8] ss:$24 sps:$4 sm:$0xff]   ;;  %v5137_v53 = vld [vmem:[%s7072_s1 + $0x2a4] ss:$24 sps:$4 sm:$0xff]   ;;  %v5168_v55 = vld [vmem:[%s7072_s1 + $0x218] ss:$24 sps:$4 sm:$0xff]  }
  0x13   :  { %1524 = vmatpush1.bf16.msra.mxu0 %v5088_v13  ;;  %1646 = vmatprep.subr.bf16.mxu1 %v5122_v22  ;;  %v5139_v54 = vld [vmem:[%s7072_s1 + $0x2a0] ss:$24 sps:$4 sm:$0xff]   ;;  %v5172_v56 = vld [vmem:[%s7072_s1 + $0x24c] ss:$24 sps:$4 sm:$0xff]   ;;  %v5145_v58 = vld [vmem:[%s7072_s1 + $0x2d0] ss:$24 sps:$4 sm:$0xff]  }
  0x14   :  { %1525 = vmatprep.subr.bf16.mxu0 %v5089_v14  ;;  %v5143_v57 = vld [vmem:[%s7072_s1 + $0x2d4] ss:$24 sps:$4 sm:$0xff]   ;;  %v5174_v59 = vld [vmem:[%s7072_s1 + $0x248] ss:$24 sps:$4 sm:$0xff]   ;;  %v5152_v61 = vld [vmem:[%s7072_s1 + $0x304] ss:$24 sps:$4 sm:$0xff]  }
  0x15   :  { %v5178_v60 = vld [vmem:[%s7072_s1 + $0x27c] ss:$24 sps:$4 sm:$0xff]   ;;  %v5150_v62 = vld [vmem:[%s7072_s1 + $0x300] ss:$24 sps:$4 sm:$0xff]   ;;  %v5184_v1 = vld [vmem:[%s7072_s1 + $0x2ac] ss:$24 sps:$4 sm:$0xff]  }
  0x16   :  { %1647 = vmatpush1.bf16.msra.mxu1 %v5124_v24  ;;  %v5180_v0 = vld [vmem:[%s7072_s1 + $0x278] ss:$24 sps:$4 sm:$0xff]   ;;  %v5159_v2 = vld [vmem:[%s7072_s1 + $0x334] ss:$24 sps:$4 sm:$0xff]   ;;  %v5186_v4 = vld [vmem:[%s7072_s1 + $0x2a8] ss:$24 sps:$4 sm:$0xff]  }
  0x17   :  { %1526 = vmatpush1.bf16.msra.mxu0 %v5091_v17  ;;  %1648 = vmatprep.subr.bf16.mxu1 %v5128_v26  ;;  %v5157_v3 = vld [vmem:[%s7072_s1 + $0x330] ss:$24 sps:$4 sm:$0xff]   ;;  %v5190_v5 = vld [vmem:[%s7072_s1 + $0x2dc] ss:$24 sps:$4 sm:$0xff]   ;;  %v5163_v7 = vld [vmem:[%s7072_s1 + $0x360] ss:$24 sps:$4 sm:$0xff]  }
  0x18   :  { %1527 = vmatprep.subr.bf16.mxu0 %v5092_v19  ;;  %v5165_v6 = vld [vmem:[%s7072_s1 + $0x364] ss:$24 sps:$4 sm:$0xff]   ;;  %v5192_v8 = vld [vmem:[%s7072_s1 + $0x2d8] ss:$24 sps:$4 sm:$0xff]   ;;  %v5171_v10 = vld [vmem:[%s7072_s1 + $0x394] ss:$24 sps:$4 sm:$0xff]  }
  0x19   :  { %v5198_v9 = vld [vmem:[%s7072_s1 + $0x30c] ss:$24 sps:$4 sm:$0xff]   ;;  %v5169_v11 = vld [vmem:[%s7072_s1 + $0x390] ss:$24 sps:$4 sm:$0xff]   ;;  %v5204_v13 = vld [vmem:[%s7072_s1 + $0x33c] ss:$24 sps:$4 sm:$0xff]  }
  0x1a   :  { %1649 = vmatpush1.bf16.msra.mxu1 %v5130_v28  ;;  %v5196_v12 = vld [vmem:[%s7072_s1 + $0x308] ss:$24 sps:$4 sm:$0xff]   ;;  %v5177_v14 = vld [vmem:[%s7072_s1 + $0x3c4] ss:$24 sps:$4 sm:$0xff]   ;;  %v5202_v18 = vld [vmem:[%s7072_s1 + $0x338] ss:$24 sps:$4 sm:$0xff]  }
  0x1b   :  { %1528 = vmatpush1.bf16.msra.mxu0 %v5094_v21  ;;  %1650 = vmatprep.subr.bf16.mxu1 %v5134_v30  ;;  %v5933_v15 = vld [vmem:[%s7071_s0 + $0x8] sm:$0xff]  ;;  %v5175_v16 = vld [vmem:[%s7072_s1 + $0x3c0] ss:$24 sps:$4 sm:$0xff]   ;;  %v5189_v24 = vld [vmem:[%s7072_s1 + $0x424] ss:$24 sps:$4 sm:$0xff]  }
  0x1c   :  { %1529 = vmatprep.subr.bf16.mxu0 %v5095_v23  ;;  %v5941_v17 = vcombine.high %v5933_v15, %v5933_v15  ;;  %v5210_v19 = vld [vmem:[%s7072_s1 + $0x36c] ss:$24 sps:$4 sm:$0xff]   ;;  %v5181_v21 = vld [vmem:[%s7072_s1 + $0x3f0] ss:$24 sps:$4 sm:$0xff]   ;;  %v5216_v23 = vld [vmem:[%s7072_s1 + $0x39c] ss:$24 sps:$4 sm:$0xff]  }
  0x1d   :  { %v5183_v20 = vld [vmem:[%s7072_s1 + $0x3f4] ss:$24 sps:$4 sm:$0xff]   ;;  %v5208_v22 = vld [vmem:[%s7072_s1 + $0x368] ss:$24 sps:$4 sm:$0xff]   ;;  %v5214_v26 = vld [vmem:[%s7072_s1 + $0x398] ss:$24 sps:$4 sm:$0xff]  }
  0x1e   :  { %1651 = vmatpush1.bf16.msra.mxu1 %v5136_v34  ;;  %v5195_v28 = vld [vmem:[%s7072_s1 + $0x454] ss:$24 sps:$4 sm:$0xff]   ;;  %v5220_v30 = vld [vmem:[%s7072_s1 + $0x3c8] ss:$24 sps:$4 sm:$0xff]   ;;  %v5201_v32 = vld [vmem:[%s7072_s1 + $0x484] ss:$24 sps:$4 sm:$0xff]  }
  0x1f   :  { %1530 = vmatpush1.bf16.msra.mxu0 %v5097_v25  ;;  %1652 = vmatprep.subr.bf16.mxu1 %v5140_v36  ;;  %v5187_v25 = vld [vmem:[%s7072_s1 + $0x420] ss:$24 sps:$4 sm:$0xff]   ;;  %v5234_v36 = vld [vmem:[%s7072_s1 + $0x42c] ss:$24 sps:$4 sm:$0xff]  }
  0x20   :  { %1531 = vmatprep.subr.bf16.mxu0 %v5101_v27  ;;  %v5222_v27 = vld [vmem:[%s7072_s1 + $0x3cc] ss:$24 sps:$4 sm:$0xff]   ;;  %v5226_v34 = vld [vmem:[%s7072_s1 + $0x3f8] ss:$24 sps:$4 sm:$0xff]  }
  0x22   :  { %1653 = vmatpush1.bf16.msra.mxu1 %v5142_v39  ;;  %v5205_v39 = vld [vmem:[%s7072_s1 + $0x4b0] ss:$24 sps:$4 sm:$0xff]  }
  0x23   :  { %1532 = vmatpush1.bf16.msra.mxu0 %v5103_v29  ;;  %1654 = vmatprep.subr.bf16.mxu1 %v5146_v40  ;;  %v5193_v29 = vld [vmem:[%s7072_s1 + $0x450] ss:$24 sps:$4 sm:$0xff]   ;;  %v5240_v40 = vld [vmem:[%s7072_s1 + $0x45c] ss:$24 sps:$4 sm:$0xff]  }
  0x24   :  { %1533 = vmatprep.subr.bf16.mxu0 %v5107_v31  ;;  %v5228_v31 = vld [vmem:[%s7072_s1 + $0x3fc] ss:$24 sps:$4 sm:$0xff]  }
  0x26   :  { %1655 = vmatpush1.bf16.msra.mxu1 %v5148_v43  ;;  %v5211_v43 = vld [vmem:[%s7072_s1 + $0x4e0] ss:$24 sps:$4 sm:$0xff]  }
  0x27   :  { %1534 = vmatpush1.bf16.msra.mxu0 %v5109_v33  ;;  %1656 = vmatprep.subr.bf16.mxu1 %v5154_v44  ;;  %v5199_v33 = vld [vmem:[%s7072_s1 + $0x480] ss:$24 sps:$4 sm:$0xff]   ;;  %v5246_v44 = vld [vmem:[%s7072_s1 + $0x48c] ss:$24 sps:$4 sm:$0xff]  }
  0x28   :  { %1535 = vmatprep.subr.bf16.mxu0 %v5113_v37  ;;  %v5207_v37 = vld [vmem:[%s7072_s1 + $0x4b4] ss:$24 sps:$4 sm:$0xff]  }
  0x2a   :  { %1657 = vmatpush1.bf16.msra.mxu1 %v5156_v47  ;;  %v5217_v47 = vld [vmem:[%s7072_s1 + $0x510] ss:$24 sps:$4 sm:$0xff]  }
  0x2b   :  { %1536 = vmatpush1.bf16.msra.mxu0 %v5115_v38  ;;  %1658 = vmatprep.subr.bf16.mxu1 %v5160_v48  ;;  %v5232_v38 = vld [vmem:[%s7072_s1 + $0x428] ss:$24 sps:$4 sm:$0xff]   ;;  %v5254_v48 = vld [vmem:[%s7072_s1 + $0x4bc] ss:$24 sps:$4 sm:$0xff]  }
  0x2c   :  { %1537 = vmatprep.subr.bf16.mxu0 %v5119_v41  ;;  %v5213_v41 = vld [vmem:[%s7072_s1 + $0x4e4] ss:$24 sps:$4 sm:$0xff]  }
  0x2e   :  { %1659 = vmatpush1.bf16.msra.mxu1 %v5162_v51  ;;  %v5223_v51 = vld [vmem:[%s7072_s1 + $0x540] ss:$24 sps:$4 sm:$0xff]  }
  0x2f   :  { %1538 = vmatpush1.bf16.msra.mxu0 %v5121_v42  ;;  %1660 = vmatprep.subr.bf16.mxu1 %v5166_v52  ;;  %v5238_v42 = vld [vmem:[%s7072_s1 + $0x458] ss:$24 sps:$4 sm:$0xff]   ;;  %v5260_v52 = vld [vmem:[%s7072_s1 + $0x4ec] ss:$24 sps:$4 sm:$0xff]  }
  0x30   :  { %1539 = vmatprep.subr.bf16.mxu0 %v5125_v45  ;;  %v5219_v45 = vld [vmem:[%s7072_s1 + $0x514] ss:$24 sps:$4 sm:$0xff]  }
  0x32   :  { %1661 = vmatpush1.bf16.msra.mxu1 %v5168_v55  ;;  %v5229_v55 = vld [vmem:[%s7072_s1 + $0x570] ss:$24 sps:$4 sm:$0xff]  }
  0x33   :  { %1540 = vmatpush1.bf16.msra.mxu0 %v5127_v46  ;;  %1662 = vmatprep.subr.bf16.mxu1 %v5172_v56  ;;  %v5244_v46 = vld [vmem:[%s7072_s1 + $0x488] ss:$24 sps:$4 sm:$0xff]   ;;  %v5266_v56 = vld [vmem:[%s7072_s1 + $0x51c] ss:$24 sps:$4 sm:$0xff]  }
  0x34   :  { %1541 = vmatprep.subr.bf16.mxu0 %v5131_v49  ;;  %v5225_v49 = vld [vmem:[%s7072_s1 + $0x544] ss:$24 sps:$4 sm:$0xff]  }
  0x36   :  { %1663 = vmatpush1.bf16.msra.mxu1 %v5174_v59  ;;  %v5235_v59 = vld [vmem:[%s7072_s1 + $0x5a0] ss:$24 sps:$4 sm:$0xff]  }
  0x37   :  { %1542 = vmatpush1.bf16.msra.mxu0 %v5133_v50  ;;  %1664 = vmatprep.subr.bf16.mxu1 %v5178_v60  ;;  %v5252_v50 = vld [vmem:[%s7072_s1 + $0x4b8] ss:$24 sps:$4 sm:$0xff]   ;;  %v5272_v60 = vld [vmem:[%s7072_s1 + $0x54c] ss:$24 sps:$4 sm:$0xff]  }
  0x38   :  { %1543 = vmatprep.subr.bf16.mxu0 %v5137_v53  ;;  %v5231_v53 = vld [vmem:[%s7072_s1 + $0x574] ss:$24 sps:$4 sm:$0xff]  }
  0x3a   :  { %1665 = vmatpush1.bf16.msra.mxu1 %v5180_v0  ;;  %v5241_v0 = vld [vmem:[%s7072_s1 + $0x5d0] ss:$24 sps:$4 sm:$0xff]  }
  0x3b   :  { %1544 = vmatpush1.bf16.msra.mxu0 %v5139_v54  ;;  %1666 = vmatprep.subr.bf16.mxu1 %v5184_v1  ;;  %v5258_v54 = vld [vmem:[%s7072_s1 + $0x4e8] ss:$24 sps:$4 sm:$0xff]   ;;  %v5278_v1 = vld [vmem:[%s7072_s1 + $0x57c] ss:$24 sps:$4 sm:$0xff]  }
  0x3c   :  { %1545 = vmatprep.subr.bf16.mxu0 %v5143_v57  ;;  %v5237_v57 = vld [vmem:[%s7072_s1 + $0x5a4] ss:$24 sps:$4 sm:$0xff]  }
  0x3e   :  { %1667 = vmatpush1.bf16.msra.mxu1 %v5186_v4  ;;  %v5276_v4 = vld [vmem:[%s7072_s1 + $0x578] ss:$24 sps:$4 sm:$0xff]  }
  0x3f   :  { %1546 = vmatpush1.bf16.msra.mxu0 %v5145_v58  ;;  %1668 = vmatprep.subr.bf16.mxu1 %v5190_v5  ;;  %v5264_v58 = vld [vmem:[%s7072_s1 + $0x518] ss:$24 sps:$4 sm:$0xff]  }
  0x40   :  { %1556 = vmatprep.subr.bf16.mxu0 %v5152_v61  ;;  %v5243_v61 = vld [vmem:[%s7072_s1 + $0x5d4] ss:$24 sps:$4 sm:$0xff]   ;;  %v5249_v5 = vld [vmem:[%s7072_s1 + $0x600] ss:$24 sps:$4 sm:$0xff]  }
  0x42   :  { %1548 = vmatmul.mubr.bf16.vlgmr.msra.gmra.mrb[0].mxu0 %v5882_v63  ;;  %1669 = vmatpush1.bf16.msra.mxu1 %v5192_v8  ;;  %v5282_v8 = vld [vmem:[%s7072_s1 + $0x5a8] ss:$24 sps:$4 sm:$0xff]  }
  0x43   :  { %1557 = vmatpush1.bf16.msra.mxu0 %v5150_v62  ;;  %1679 = vmatprep.subr.bf16.mxu1 %v5198_v9  ;;  %v5270_v62 = vld [vmem:[%s7072_s1 + $0x548] ss:$24 sps:$4 sm:$0xff]  }
  0x44   :  { %1558 = vmatprep.subr.bf16.mxu0 %v5159_v2  ;;  %1588 = vmatprep.mubr.bf16.mxu0 %v5941_v17  ;;  %v5251_v2 = vld [vmem:[%s7072_s1 + $0x604] ss:$24 sps:$4 sm:$0xff]   ;;  %v5255_v9 = vld [vmem:[%s7072_s1 + $0x630] ss:$24 sps:$4 sm:$0xff]  }
  0x45   :  { %1671 = vmatmul.mubr.bf16.vlgmr.msra.gmra.mrb[0].mxu1 %v5882_v63 }
  0x46   :  { %1680 = vmatpush1.bf16.msra.mxu1 %v5196_v12  ;;  %1711 = vmatprep.mubr.bf16.mxu1 %v5941_v17  ;;  %v5660_v12 = vmov 0  }
  0x47   :  { %1559 = vmatpush1.bf16.msra.mxu0 %v5157_v3  ;;  %1681 = vmatprep.subr.bf16.mxu1 %v5204_v13  ;;  %v6088_v3 = vcombine.low %v5933_v15, %v5933_v15  ;;  %v5288_v13 = vld [vmem:[%s7072_s1 + $0x5d8] ss:$24 sps:$4 sm:$0xff]   ;;  %v5296_v15 = vld [vmem:[%s7072_s1 + $0x60c] ss:$24 sps:$4 sm:$0xff]  }
  0x48   :  { %1560 = vmatprep.subr.bf16.mxu0 %v5165_v6  ;;  %v5284_v6 = vld [vmem:[%s7072_s1 + $0x5ac] ss:$24 sps:$4 sm:$0xff]  }
  0x4a   :  { %1682 = vmatpush1.bf16.msra.mxu1 %v5202_v18  ;;  %v5294_v18 = vld [vmem:[%s7072_s1 + $0x608] ss:$24 sps:$4 sm:$0xff]  }
  0x4b   :  { %1561 = vmatpush1.bf16.msra.mxu0 %v5163_v7  ;;  %1683 = vmatprep.subr.bf16.mxu1 %v5210_v19  ;;  %v5257_v7 = vld [vmem:[%s7072_s1 + $0x634] ss:$24 sps:$4 sm:$0xff]   ;;  %v5267_v19 = vld [vmem:[%s7072_s1 + $0x690] ss:$24 sps:$4 sm:$0xff]  }
  0x4c   :  { %1562 = vmatprep.subr.bf16.mxu0 %v5171_v10  ;;  %v5290_v10 = vld [vmem:[%s7072_s1 + $0x5dc] ss:$24 sps:$4 sm:$0xff]  }
  0x4e   :  { %1684 = vmatpush1.bf16.msra.mxu1 %v5208_v22  ;;  %v5301_v22 = vld [vmem:[%s7072_s1 + $0x638] ss:$24 sps:$4 sm:$0xff]  }
  0x4f   :  { %1563 = vmatpush1.bf16.msra.mxu0 %v5169_v11  ;;  %1685 = vmatprep.subr.bf16.mxu1 %v5216_v23  ;;  %v5263_v11 = vld [vmem:[%s7072_s1 + $0x664] ss:$24 sps:$4 sm:$0xff]   ;;  %v5273_v23 = vld [vmem:[%s7072_s1 + $0x6c0] ss:$24 sps:$4 sm:$0xff]  }
  0x50   :  { %1564 = vmatprep.subr.bf16.mxu0 %v5177_v14  ;;  %v5261_v14 = vld [vmem:[%s7072_s1 + $0x660] ss:$24 sps:$4 sm:$0xff]  }
  0x52   :  { %1686 = vmatpush1.bf16.msra.mxu1 %v5214_v26  ;;  %v5279_v26 = vld [vmem:[%s7072_s1 + $0x6f0] ss:$24 sps:$4 sm:$0xff]  }
  0x53   :  { %1565 = vmatpush1.bf16.msra.mxu0 %v5175_v16  ;;  %1687 = vmatprep.subr.bf16.mxu1 %v5222_v27  ;;  %v5269_v16 = vld [vmem:[%s7072_s1 + $0x694] ss:$24 sps:$4 sm:$0xff]   ;;  %v5307_v27 = vld [vmem:[%s7072_s1 + $0x668] ss:$24 sps:$4 sm:$0xff]  }
  0x54   :  { %1566 = vmatprep.subr.bf16.mxu0 %v5183_v20  ;;  %v5303_v20 = vld [vmem:[%s7072_s1 + $0x63c] ss:$24 sps:$4 sm:$0xff]  }
  0x56   :  { %1688 = vmatpush1.bf16.msra.mxu1 %v5220_v30  ;;  %v5313_v30 = vld [vmem:[%s7072_s1 + $0x698] ss:$24 sps:$4 sm:$0xff]  }
  0x57   :  { %1567 = vmatpush1.bf16.msra.mxu0 %v5181_v21  ;;  %1689 = vmatprep.subr.bf16.mxu1 %v5228_v31  ;;  %v5275_v21 = vld [vmem:[%s7072_s1 + $0x6c4] ss:$24 sps:$4 sm:$0xff]   ;;  %v5285_v31 = vld [vmem:[%s7072_s1 + $0x720] ss:$24 sps:$4 sm:$0xff]  }
  0x58   :  { %1568 = vmatprep.subr.bf16.mxu0 %v5189_v24  ;;  %v5309_v24 = vld [vmem:[%s7072_s1 + $0x66c] ss:$24 sps:$4 sm:$0xff]  }
  0x5a   :  { %1690 = vmatpush1.bf16.msra.mxu1 %v5226_v34  ;;  %v5319_v34 = vld [vmem:[%s7072_s1 + $0x6c8] ss:$24 sps:$4 sm:$0xff]  }
  0x5b   :  { %1569 = vmatpush1.bf16.msra.mxu0 %v5187_v25  ;;  %1691 = vmatprep.subr.bf16.mxu1 %v5234_v36  ;;  %v5281_v25 = vld [vmem:[%s7072_s1 + $0x6f4] ss:$24 sps:$4 sm:$0xff]   ;;  %v5291_v36 = vld [vmem:[%s7072_s1 + $0x750] ss:$24 sps:$4 sm:$0xff]  }
  0x5c   :  { %1570 = vmatprep.subr.bf16.mxu0 %v5195_v28  ;;  %v5287_v28 = vld [vmem:[%s7072_s1 + $0x724] ss:$24 sps:$4 sm:$0xff]  }
  0x5e   :  { %1692 = vmatpush1.bf16.msra.mxu1 %v5232_v38  ;;  %v5327_v38 = vld [vmem:[%s7072_s1 + $0x6fc] ss:$24 sps:$4 sm:$0xff]  }
  0x5f   :  { %1571 = vmatpush1.bf16.msra.mxu0 %v5193_v29  ;;  %1693 = vmatprep.subr.bf16.mxu1 %v5240_v40  ;;  %v5315_v29 = vld [vmem:[%s7072_s1 + $0x69c] ss:$24 sps:$4 sm:$0xff]   ;;  %v5325_v40 = vld [vmem:[%s7072_s1 + $0x6f8] ss:$24 sps:$4 sm:$0xff]  }
  0x60   :  { %1572 = vmatprep.subr.bf16.mxu0 %v5201_v32  ;;  %v5293_v32 = vld [vmem:[%s7072_s1 + $0x754] ss:$24 sps:$4 sm:$0xff]  }
  0x62   :  { %1694 = vmatpush1.bf16.msra.mxu1 %v5238_v42  ;;  %v5306_v42 = vld [vmem:[%s7072_s1 + $0x44] ss:$24 sps:$4 sm:$0xff]  }
  0x63   :  { %1573 = vmatpush1.bf16.msra.mxu0 %v5199_v33  ;;  %1695 = vmatprep.subr.bf16.mxu1 %v5246_v44  ;;  %v5321_v33 = vld [vmem:[%s7072_s1 + $0x6cc] ss:$24 sps:$4 sm:$0xff]   ;;  %v5331_v44 = vld [vmem:[%s7072_s1 + $0x728] ss:$24 sps:$4 sm:$0xff]  }
  0x64   :  { %1574 = vmatprep.subr.bf16.mxu0 %v5207_v37  ;;  %v5300_v37 = vld [vmem:[%s7072_s1 + $0x14] ss:$24 sps:$4 sm:$0xff]  }
  0x66   :  { %1696 = vmatpush1.bf16.msra.mxu1 %v5244_v46  ;;  %v5312_v46 = vld [vmem:[%s7072_s1 + $0x74] ss:$24 sps:$4 sm:$0xff]  }
  0x67   :  { %1575 = vmatpush1.bf16.msra.mxu0 %v5205_v39  ;;  %1697 = vmatprep.subr.bf16.mxu1 %v5254_v48  ;;  %v5297_v39 = vld [vmem:[%s7071_s0 + $0x10] ss:$0 sps:$4 sm:$0xff]  }
  0x68   :  { %1576 = vmatprep.subr.bf16.mxu0 %v5213_v41  ;;  %v5298_v41 = vld [vmem:[%s7072_s1 + $0x10] ss:$24 sps:$4 sm:$0xff]  }
  0x69   :  { %v5337_v48 = vld [vmem:[%s7072_s1 + $0x758] ss:$24 sps:$4 sm:$0xff]  }
  0x6a   :  { %1698 = vmatpush1.bf16.msra.mxu1 %v5252_v50  ;;  %v5318_v50 = vld [vmem:[%s7072_s1 + $0xa4] ss:$24 sps:$4 sm:$0xff]  }
  0x6b   :  { %1577 = vmatpush1.bf16.msra.mxu0 %v5211_v43  ;;  %1699 = vmatprep.subr.bf16.mxu1 %v5260_v52  ;;  %v5333_v43 = vld [vmem:[%s7072_s1 + $0x72c] ss:$24 sps:$4 sm:$0xff]   ;;  %v5322_v52 = vld [vmem:[%s7072_s1 + $0xd0] ss:$24 sps:$4 sm:$0xff]  }
  0x6c   :  { %1578 = vmatprep.subr.bf16.mxu0 %v5219_v45  ;;  %v5304_v45 = vld [vmem:[%s7072_s1 + $0x40] ss:$24 sps:$4 sm:$0xff]  }
  0x6e   :  { %1700 = vmatpush1.bf16.msra.mxu1 %v5258_v54  ;;  %v5328_v54 = vld [vmem:[%s7072_s1 + $0x100] ss:$24 sps:$4 sm:$0xff]  }
  0x6f   :  { %1579 = vmatpush1.bf16.msra.mxu0 %v5217_v47  ;;  %1701 = vmatprep.subr.bf16.mxu1 %v5266_v56  ;;  %v5339_v47 = vld [vmem:[%s7072_s1 + $0x75c] ss:$24 sps:$4 sm:$0xff]   ;;  %v5334_v56 = vld [vmem:[%s7072_s1 + $0x130] ss:$24 sps:$4 sm:$0xff]  }
  0x70   :  { %1580 = vmatprep.subr.bf16.mxu0 %v5225_v49  ;;  %v5310_v49 = vld [vmem:[%s7072_s1 + $0x70] ss:$24 sps:$4 sm:$0xff]  }
  0x72   :  { %1702 = vmatpush1.bf16.msra.mxu1 %v5264_v58  ;;  %v5340_v58 = vld [vmem:[%s7072_s1 + $0x160] ss:$24 sps:$4 sm:$0xff]  }
  0x73   :  { %1581 = vmatpush1.bf16.msra.mxu0 %v5223_v51  ;;  %1703 = vmatprep.subr.bf16.mxu1 %v5272_v60  ;;  %v5316_v51 = vld [vmem:[%s7072_s1 + $0xa0] ss:$24 sps:$4 sm:$0xff]   ;;  %v5343_v60 = vld [vmem:[%s7072_s1 + $0x190] ss:$24 sps:$4 sm:$0xff]  }
  0x74   :  { %1582 = vmatprep.subr.bf16.mxu0 %v5231_v53  ;;  %v5330_v53 = vld [vmem:[%s7072_s1 + $0x104] ss:$24 sps:$4 sm:$0xff]  }
  0x76   :  { %1704 = vmatpush1.bf16.msra.mxu1 %v5270_v62  ;;  %v5439_v62 = vld [vmem:[%s7074_s3 + $0x40] sm:$0xff]  }
  0x77   :  { %1583 = vmatpush1.bf16.msra.mxu0 %v5229_v55  ;;  %1705 = vmatprep.subr.bf16.mxu1 %v5278_v1  ;;  %v5336_v55 = vld [vmem:[%s7072_s1 + $0x134] ss:$24 sps:$4 sm:$0xff]  }
  0x78   :  { %1584 = vmatprep.subr.bf16.mxu0 %v5237_v57  ;;  %v5342_v57 = vld [vmem:[%s7072_s1 + $0x164] ss:$24 sps:$4 sm:$0xff]   ;;  %v5441_v1 = vld [vmem:[%s7074_s3 + $0x48] sm:$0xff]  }
  0x7a   :  { %1706 = vmatpush1.bf16.msra.mxu1 %v5276_v4  ;;  %v5351_v4 = vld [vmem:[%s7072_s1 + $0x1f4] ss:$24 sps:$4 sm:$0xff]  }
  0x7b   :  { %1585 = vmatpush1.bf16.msra.mxu0 %v5235_v59  ;;  %1707 = vmatprep.subr.bf16.mxu1 %v5284_v6  ;;  %v5345_v59 = vld [vmem:[%s7072_s1 + $0x194] ss:$24 sps:$4 sm:$0xff]  }
  0x7c   :  { %1586 = vmatprep.subr.bf16.mxu0 %v5243_v61  ;;  %v5348_v61 = vld [vmem:[%s7072_s1 + $0x1c4] ss:$24 sps:$4 sm:$0xff]   ;;  %v5442_v6 = vld [vmem:[%s7074_s3 + $0x8] sm:$0xff]  }
  0x7e   :  { %1708 = vmatpush1.bf16.msra.mxu1 %v5282_v8  ;;  %v5443_v8 = vld [vmem:[%s7074_s3 + $0x50] sm:$0xff]  }
  0x7f   :  { %1587 = vmatpush1.bf16.msra.mxu0 %v5241_v0  ;;  %1709 = vmatprep.subr.bf16.mxu1 %v5290_v10  ;;  %v5440_v0 = vld [vmem:[%s7074_s3] sm:$0xff]   ;;  %v5445_v10 = vld [vmem:[%s7074_s3 + $0x58] sm:$0xff]  }
  0x80   :  { %1597 = vmatprep.subr.bf16.mxu0 %v5251_v2  ;;  %v5346_v2 = vld [vmem:[%s7072_s1 + $0x1c0] ss:$24 sps:$4 sm:$0xff]  }
  0x82   :  { %1589 = vmatmul.mubr.bf16.vlgmr.msra.gmra.mrb[0].mxu0 %v6088_v3  ;;  %1710 = vmatpush1.bf16.msra.mxu1 %v5288_v13  ;;  %v5357_v13 = vld [vmem:[%s7072_s1 + $0x254] ss:$24 sps:$4 sm:$0xff]  }
  0x83   :  { %1598 = vmatpush1.bf16.msra.mxu0 %v5249_v5  ;;  %1629 = vmatprep.mubr.bf16.mxu0 %v5660_v12  ;;  %v5349_v5 = vld [vmem:[%s7072_s1 + $0x1f0] ss:$24 sps:$4 sm:$0xff]  }
  0x84   :  { %1599 = vmatprep.subr.bf16.mxu0 %v5257_v7  ;;  %1720 = vmatprep.subr.bf16.mxu1 %v5296_v15  ;;  %v5354_v7 = vld [vmem:[%s7072_s1 + $0x224] ss:$24 sps:$4 sm:$0xff]  }
  0x85   :  { %1712 = vmatmul.mubr.bf16.vlgmr.msra.gmra.mrb[0].mxu1 %v6088_v3  ;;  %v5447_v15 = vld [vmem:[%s7074_s3 + $0x60] sm:$0xff]  }
  0x86   :  { %1721 = vmatpush1.bf16.msra.mxu1 %v5294_v18  ;;  %1752 = vmatprep.mubr.bf16.mxu1 %v5660_v12  ;;  %v5360_v18 = vld [vmem:[%s7072_s1 + $0x284] ss:$24 sps:$4 sm:$0xff]  }
  0x87   :  { %1600 = vmatpush1.bf16.msra.mxu0 %v5255_v9  ;;  %1722 = vmatprep.subr.bf16.mxu1 %v5303_v20  ;;  %v5444_v9 = vld [vmem:[%s7074_s3 + $0x10] sm:$0xff]   ;;  %v5358_v20 = vld [vmem:[%s7072_s1 + $0x280] ss:$24 sps:$4 sm:$0xff]  }
  0x88   :  { %1601 = vmatprep.subr.bf16.mxu0 %v5263_v11  ;;  %v5352_v11 = vld [vmem:[%s7072_s1 + $0x220] ss:$24 sps:$4 sm:$0xff]  }
  0x8a   :  { %1723 = vmatpush1.bf16.msra.mxu1 %v5301_v22  ;;  %v5361_v22 = vld [vmem:[%s7072_s1 + $0x2b0] ss:$24 sps:$4 sm:$0xff]  }
  0x8b   :  { %1602 = vmatpush1.bf16.msra.mxu0 %v5261_v14  ;;  %1724 = vmatprep.subr.bf16.mxu1 %v5309_v24  ;;  %v5446_v14 = vld [vmem:[%s7074_s3 + $0x18] sm:$0xff]  }
  0x8c   :  { %1603 = vmatprep.subr.bf16.mxu0 %v5269_v16  ;;  %v5355_v16 = vld [vmem:[%s7072_s1 + $0x250] ss:$24 sps:$4 sm:$0xff]   ;;  %v5364_v24 = vld [vmem:[%s7072_s1 + $0x2e0] ss:$24 sps:$4 sm:$0xff]  }
  0x8e   :  { %1725 = vmatpush1.bf16.msra.mxu1 %v5307_v27  ;;  %v5372_v27 = vld [vmem:[%s7072_s1 + $0x344] ss:$24 sps:$4 sm:$0xff]  }
  0x8f   :  { %1604 = vmatpush1.bf16.msra.mxu0 %v5267_v19  ;;  %1726 = vmatprep.subr.bf16.mxu1 %v5315_v29  ;;  %v5448_v19 = vld [vmem:[%s7074_s3 + $0x20] sm:$0xff]   ;;  %v5375_v29 = vld [vmem:[%s7072_s1 + $0x374] ss:$24 sps:$4 sm:$0xff]  }
  0x90   :  { %1605 = vmatprep.subr.bf16.mxu0 %v5275_v21  ;;  %v5363_v21 = vld [vmem:[%s7072_s1 + $0x2b4] ss:$24 sps:$4 sm:$0xff]  }
  0x92   :  { %1727 = vmatpush1.bf16.msra.mxu1 %v5313_v30  ;;  %v5373_v30 = vld [vmem:[%s7072_s1 + $0x370] ss:$24 sps:$4 sm:$0xff]  }
  0x93   :  { %1606 = vmatpush1.bf16.msra.mxu0 %v5273_v23  ;;  %1728 = vmatprep.subr.bf16.mxu1 %v5321_v33  ;;  %v5366_v23 = vld [vmem:[%s7072_s1 + $0x2e4] ss:$24 sps:$4 sm:$0xff]  }
  0x94   :  { %1607 = vmatprep.subr.bf16.mxu0 %v5281_v25  ;;  %v5369_v25 = vld [vmem:[%s7072_s1 + $0x314] ss:$24 sps:$4 sm:$0xff]   ;;  %v5384_v33 = vld [vmem:[%s7072_s1 + $0x404] ss:$24 sps:$4 sm:$0xff]  }
  0x96   :  { %1729 = vmatpush1.bf16.msra.mxu1 %v5319_v34  ;;  %v5382_v34 = vld [vmem:[%s7072_s1 + $0x400] ss:$24 sps:$4 sm:$0xff]  }
  0x97   :  { %1608 = vmatpush1.bf16.msra.mxu0 %v5279_v26  ;;  %1730 = vmatprep.subr.bf16.mxu1 %v5327_v38  ;;  %v5367_v26 = vld [vmem:[%s7072_s1 + $0x310] ss:$24 sps:$4 sm:$0xff]  }
  0x98   :  { %1609 = vmatprep.subr.bf16.mxu0 %v5287_v28  ;;  %v5370_v28 = vld [vmem:[%s7072_s1 + $0x340] ss:$24 sps:$4 sm:$0xff]   ;;  %v5449_v38 = vld [vmem:[%s7074_s3 + $0x68] sm:$0xff]  }
  0x9a   :  { %1731 = vmatpush1.bf16.msra.mxu1 %v5325_v40  ;;  %v5450_v40 = vld [vmem:[%s7074_s3 + $0x28] sm:$0xff]  }
  0x9b   :  { %1610 = vmatpush1.bf16.msra.mxu0 %v5285_v31  ;;  %1732 = vmatprep.subr.bf16.mxu1 %v5333_v43  ;;  %v5378_v31 = vld [vmem:[%s7072_s1 + $0x3a4] ss:$24 sps:$4 sm:$0xff]   ;;  %v5452_v43 = vld [vmem:[%s7074_s3 + $0x30] sm:$0xff]  }
  0x9c   :  { %1611 = vmatprep.subr.bf16.mxu0 %v5293_v32  ;;  %v5381_v32 = vld [vmem:[%s7072_s1 + $0x3d4] ss:$24 sps:$4 sm:$0xff]  }
  0x9e   :  { %1733 = vmatpush1.bf16.msra.mxu1 %v5331_v44  ;;  %v5453_v44 = vld [vmem:[%s7074_s3 + $0x78] sm:$0xff]  }
  0x9f   :  { %1612 = vmatpush1.bf16.msra.mxu0 %v5291_v36  ;;  %1734 = vmatprep.subr.bf16.mxu1 %v5339_v47  ;;  %v5387_v36 = vld [vmem:[%s7072_s1 + $0x434] ss:$24 sps:$4 sm:$0xff]   ;;  %v5391_v47 = vld [vmem:[%s7072_s1 + $0x490] ss:$24 sps:$4 sm:$0xff]  }
  0xa0   :  { %1761 = vmatprep.subr.bf16.mxu0 %v5300_v37  ;;  %v5385_v37 = vld [vmem:[%s7072_s1 + $0x430] ss:$24 sps:$4 sm:$0xff]  }
  0xa2   :  { %1630 = vmatmul.mubr.bf16.vlgmr.msra.gmra.mrb[0].mxu0 %v5297_v39  ;;  %1735 = vmatpush1.bf16.msra.mxu1 %v5337_v48  ;;  %v5396_v48 = vld [vmem:[%s7072_s1 + $0x4c4] ss:$24 sps:$4 sm:$0xff]  }
  0xa3   :  { %1762 = vmatpush1.bf16.msra.mxu0 %v5298_v41  ;;  %1793 = vmatprep.mubr.bf16.mxu0 %v5797_v35  ;;  %v5324_v35 = vld [vmem:[%s7072_s1 + $0xd4] ss:$24 sps:$4 sm:$0xff]   ;;  %v5388_v41 = vld [vmem:[%s7072_s1 + $0x460] ss:$24 sps:$4 sm:$0xff]  }
  0xa4   :  { %1763 = vmatprep.subr.bf16.mxu0 %v5306_v42  ;;  %4778 = vmatprep.subr.bf16.mxu1 %v5439_v62  ;;  %v5451_v42 = vld [vmem:[%s7074_s3 + $0x70] sm:$0xff]  }
  0xa5   :  { %1753 = vmatmul.mubr.bf16.vlgmr.msra.gmra.mrb[0].mxu1 %v5297_v39  ;;  %v5390_v39 = vld [vmem:[%s7072_s1 + $0x464] ss:$24 sps:$4 sm:$0xff]   ;;  %v5417_v62 = vld [vmem:[%s7072_s1 + $0x614] ss:$24 sps:$4 sm:$0xff]  }
  0xa6   :  { %4779 = vmatpush3.bf16.msra.mxu1 %v5440_v0  ;;  %v5415_v0 = vld [vmem:[%s7072_s1 + $0x610] ss:$24 sps:$4 sm:$0xff]  }
  0xa7   :  { %1764 = vmatpush1.bf16.msra.mxu0 %v5304_v45  ;;  %4780 = vmatprep.subr.bf16.mxu1 %v5441_v1  ;;  %v5393_v45 = vld [vmem:[%s7072_s1 + $0x494] ss:$24 sps:$4 sm:$0xff]   ;;  %v5420_v1 = vld [vmem:[%s7072_s1 + $0x644] ss:$24 sps:$4 sm:$0xff]  }
  0xa8   :  { %1765 = vmatprep.subr.bf16.mxu0 %v5312_v46  ;;  %v5454_v46 = vld [vmem:[%s7074_s3 + $0x38] sm:$0xff]  }
  0xaa   :  { %4781 = vmatpush3.bf16.msra.mxu1 %v5442_v6  ;;  %v5426_v6 = vld [vmem:[%s7072_s1 + $0x6a4] ss:$24 sps:$4 sm:$0xff]  }
  0xab   :  { %1766 = vmatpush1.bf16.msra.mxu0 %v5310_v49  ;;  %4782 = vmatprep.subr.bf16.mxu1 %v5443_v8  ;;  %v5394_v49 = vld [vmem:[%s7072_s1 + $0x4c0] ss:$24 sps:$4 sm:$0xff]   ;;  %v5432_v8 = vld [vmem:[%s7072_s1 + $0x704] ss:$24 sps:$4 sm:$0xff]  }
  0xac   :  { %1767 = vmatprep.subr.bf16.mxu0 %v5318_v50  ;;  %v5455_v50 = vld [vmem:[%s7074_s3 + $0xc0] sm:$0xff]  }
  0xae   :  { %4783 = vmatpush3.bf16.msra.mxu1 %v5444_v9  ;;  %v5430_v9 = vld [vmem:[%s7072_s1 + $0x700] ss:$24 sps:$4 sm:$0xff]  }
  0xaf   :  { %1768 = vmatpush1.bf16.msra.mxu0 %v5316_v51  ;;  %4784 = vmatprep.subr.bf16.mxu1 %v5445_v10  ;;  %v5399_v51 = vld [vmem:[%s7072_s1 + $0x4f4] ss:$24 sps:$4 sm:$0xff]  }
  0xb0   :  { %1769 = vmatprep.subr.bf16.mxu0 %v5324_v35  ;;  %v5397_v35 = vld [vmem:[%s7072_s1 + $0x4f0] ss:$24 sps:$4 sm:$0xff]  }
  0xb2   :  { %4785 = vmatpush3.bf16.msra.mxu1 %v5446_v14 }
  0xb3   :  { %1770 = vmatpush1.bf16.msra.mxu0 %v5322_v52  ;;  %4786 = vmatprep.subr.bf16.mxu1 %v5447_v15  ;;  %v5402_v52 = vld [vmem:[%s7072_s1 + $0x524] ss:$24 sps:$4 sm:$0xff]  }
  0xb4   :  { %1771 = vmatprep.subr.bf16.mxu0 %v5330_v53  ;;  %v5400_v53 = vld [vmem:[%s7072_s1 + $0x520] ss:$24 sps:$4 sm:$0xff]  }
  0xb6   :  { %4787 = vmatpush3.bf16.msra.mxu1 %v5448_v19 }
  0xb7   :  { %1772 = vmatpush1.bf16.msra.mxu0 %v5328_v54  ;;  %4788 = vmatprep.subr.bf16.mxu1 %v5449_v38  ;;  %v5405_v54 = vld [vmem:[%s7072_s1 + $0x554] ss:$24 sps:$4 sm:$0xff]  }
  0xb8   :  { %1773 = vmatprep.subr.bf16.mxu0 %v5336_v55  ;;  %v5403_v55 = vld [vmem:[%s7072_s1 + $0x550] ss:$24 sps:$4 sm:$0xff]  }
  0xba   :  { %4789 = vmatpush3.bf16.msra.mxu1 %v5450_v40 }
  0xbb   :  { %1774 = vmatpush1.bf16.msra.mxu0 %v5334_v56  ;;  %4790 = vmatprep.subr.bf16.mxu1 %v5451_v42  ;;  %v5408_v56 = vld [vmem:[%s7072_s1 + $0x584] ss:$24 sps:$4 sm:$0xff]  }
  0xbc   :  { %1775 = vmatprep.subr.bf16.mxu0 %v5342_v57  ;;  %v5406_v57 = vld [vmem:[%s7072_s1 + $0x580] ss:$24 sps:$4 sm:$0xff]  }
  0xbe   :  { %4791 = vmatpush3.bf16.msra.mxu1 %v5452_v43 }
  0xbf   :  { %1776 = vmatpush1.bf16.msra.mxu0 %v5340_v58  ;;  %4792 = vmatprep.subr.bf16.mxu1 %v5453_v44  ;;  %v5411_v58 = vld [vmem:[%s7072_s1 + $0x5b4] ss:$24 sps:$4 sm:$0xff]  }
  0xc0   :  { %1777 = vmatprep.subr.bf16.mxu0 %v5345_v59  ;;  %v5409_v59 = vld [vmem:[%s7072_s1 + $0x5b0] ss:$24 sps:$4 sm:$0xff]  }
  0xc2   :  { %4793 = vmatpush3.bf16.msra.mxu1 %v5454_v46 }
  0xc3   :  { %1778 = vmatpush1.bf16.msra.mxu0 %v5343_v60  ;;  %4800 = vmatprep.subr.bf16.mxu1 %v5455_v50  ;;  %v5414_v60 = vld [vmem:[%s7072_s1 + $0x5e4] ss:$24 sps:$4 sm:$0xff]  }
  0xc4   :  { %1779 = vmatprep.subr.bf16.mxu0 %v5348_v61  ;;  %v5412_v61 = vld [vmem:[%s7072_s1 + $0x5e0] ss:$24 sps:$4 sm:$0xff]  }
  0xc7   :  { %1780 = vmatpush1.bf16.msra.mxu0 %v5346_v2  ;;  %v5418_v2 = vld [vmem:[%s7072_s1 + $0x640] ss:$24 sps:$4 sm:$0xff]  }
  0xc8   :  { %1781 = vmatprep.subr.bf16.mxu0 %v5351_v4  ;;  %v5423_v4 = vld [vmem:[%s7072_s1 + $0x674] ss:$24 sps:$4 sm:$0xff]  }
  0xcb   :  { %1782 = vmatpush1.bf16.msra.mxu0 %v5349_v5  ;;  %v5421_v5 = vld [vmem:[%s7072_s1 + $0x670] ss:$24 sps:$4 sm:$0xff]  }
  0xcc   :  { %1783 = vmatprep.subr.bf16.mxu0 %v5354_v7  ;;  %v5427_v7 = vld [vmem:[%s7072_s1 + $0x6d0] ss:$24 sps:$4 sm:$0xff]  }
  0xcf   :  { %1784 = vmatpush1.bf16.msra.mxu0 %v5352_v11 }
  0xd0   :  { %1785 = vmatprep.subr.bf16.mxu0 %v5357_v13 }
  0xd3   :  { %1786 = vmatpush1.bf16.msra.mxu0 %v5355_v16 }
  0xd4   :  { %1787 = vmatprep.subr.bf16.mxu0 %v5360_v18 }
  0xd7   :  { %1788 = vmatpush1.bf16.msra.mxu0 %v5358_v20 }
  0xd8   :  { %1789 = vmatprep.subr.bf16.mxu0 %v5363_v21 }
  0xdb   :  { %1790 = vmatpush1.bf16.msra.mxu0 %v5361_v22 }
  0xdc   :  { %1791 = vmatprep.subr.bf16.mxu0 %v5366_v23 }
  0xdf   :  { %1792 = vmatpush1.bf16.msra.mxu0 %v5364_v24 }
  0xe0   :  { %1802 = vmatprep.subr.bf16.mxu0 %v5369_v25 }
  0xe2   :  { %1794 = vmatmul.mubr.bf16.vlgmr.msra.gmra.mrb[4].mxu0 %v5882_v63  ;;  %v5376_v63 = vld [vmem:[%s7072_s1 + $0x3a0] ss:$24 sps:$4 sm:$0xff]  }
  0xe3   :  { %1803 = vmatpush1.bf16.msra.mxu0 %v5367_v26  ;;  %1834 = vmatprep.mubr.bf16.mxu0 %v5941_v17  ;;  %v5379_v17 = vld [vmem:[%s7072_s1 + $0x3d0] ss:$24 sps:$4 sm:$0xff]  }
  0xe4   :  { %1804 = vmatprep.subr.bf16.mxu0 %v5372_v27 }
  0xe7   :  { %1805 = vmatpush1.bf16.msra.mxu0 %v5370_v28 }
  0xe8   :  { %1806 = vmatprep.subr.bf16.mxu0 %v5375_v29 }
  0xeb   :  { %1807 = vmatpush1.bf16.msra.mxu0 %v5373_v30 }
  0xec   :  { %1808 = vmatprep.subr.bf16.mxu0 %v5378_v31 }
  0xef   :  { %1809 = vmatpush1.bf16.msra.mxu0 %v5376_v63 }
  0xf0   :  { %1810 = vmatprep.subr.bf16.mxu0 %v5381_v32 }
  0xf3   :  { %1811 = vmatpush1.bf16.msra.mxu0 %v5379_v17 }
  0xf4   :  { %1812 = vmatprep.subr.bf16.mxu0 %v5384_v33 }
  0xf7   :  { %1813 = vmatpush1.bf16.msra.mxu0 %v5382_v34 }
  0xf8   :  { %1814 = vmatprep.subr.bf16.mxu0 %v5387_v36 }
  0xfb   :  { %1815 = vmatpush1.bf16.msra.mxu0 %v5385_v37 }
  0xfc   :  { %1816 = vmatprep.subr.bf16.mxu0 %v5390_v39 }
  0xff   :  { %1817 = vmatpush1.bf16.msra.mxu0 %v5388_v41 }
 0x100   :  { %1818 = vmatprep.subr.bf16.mxu0 %v5393_v45 }
 0x103   :  { %1819 = vmatpush1.bf16.msra.mxu0 %v5391_v47 }
 0x104   :  { %1820 = vmatprep.subr.bf16.mxu0 %v5396_v48 }
 0x107   :  { %1821 = vmatpush1.bf16.msra.mxu0 %v5394_v49 }
 0x108   :  { %1822 = vmatprep.subr.bf16.mxu0 %v5399_v51 }
 0x10b   :  { %1823 = vmatpush1.bf16.msra.mxu0 %v5397_v35 }
 0x10c   :  { %1824 = vmatprep.subr.bf16.mxu0 %v5402_v52 }
 0x10f   :  { %1825 = vmatpush1.bf16.msra.mxu0 %v5400_v53 }
 0x110   :  { %1826 = vmatprep.subr.bf16.mxu0 %v5405_v54 }
 0x113   :  { %1827 = vmatpush1.bf16.msra.mxu0 %v5403_v55 }
 0x114   :  { %1828 = vmatprep.subr.bf16.mxu0 %v5408_v56 }
 0x117   :  { %1829 = vmatpush1.bf16.msra.mxu0 %v5406_v57 }
 0x118   :  { %1830 = vmatprep.subr.bf16.mxu0 %v5411_v58 }
 0x11b   :  { %1831 = vmatpush1.bf16.msra.mxu0 %v5409_v59 }
 0x11c   :  { %1832 = vmatprep.subr.bf16.mxu0 %v5414_v60 }
 0x11f   :  { %1833 = vmatpush1.bf16.msra.mxu0 %v5412_v61 }
 0x120   :  { %1843 = vmatprep.subr.bf16.mxu0 %v5417_v62 }
 0x122   :  { %1835 = vmatmul.mubr.bf16.vlgmr.msra.gmra.mrb[4].mxu0 %v6088_v3  ;;  %v5424_v3 = vld [vmem:[%s7072_s1 + $0x6a0] ss:$24 sps:$4 sm:$0xff]  }
 0x123   :  { %1844 = vmatpush1.bf16.msra.mxu0 %v5415_v0  ;;  %1875 = vmatprep.mubr.bf16.mxu0 %v5660_v12  ;;  %v5429_v12 = vld [vmem:[%s7072_s1 + $0x6d4] ss:$24 sps:$4 sm:$0xff]  }
 0x124   :  { %1845 = vmatprep.subr.bf16.mxu0 %v5420_v1 }
 0x127   :  { %1846 = vmatpush1.bf16.msra.mxu0 %v5418_v2 }
 0x128   :  { %1847 = vmatprep.subr.bf16.mxu0 %v5423_v4 }
 0x12b   :  { %1848 = vmatpush1.bf16.msra.mxu0 %v5421_v5 }
 0x12c   :  { %1849 = vmatprep.subr.bf16.mxu0 %v5426_v6 }
 0x12f   :  { %1850 = vmatpush1.bf16.msra.mxu0 %v5424_v3 }
 0x130   :  { %1851 = vmatprep.subr.bf16.mxu0 %v5429_v12 }
 0x133   :  { %1852 = vmatpush1.bf16.msra.mxu0 %v5427_v7 }
 0x134   :  { %10 = vsyncpa [#allocation4], 0  ;;  %1853 = vmatprep.subr.bf16.mxu0 %v5432_v8  ;;  %v5435_v10 = vld [vmem:[%s7072_s1 + $0x734] ss:$24 sps:$4 sm:$0xff]   ;;  %v5433_v11 = vld [vmem:[%s7072_s1 + $0x730] ss:$24 sps:$4 sm:$0xff]   ;;  %v267_v25 = vlaneseq }
 0x135   :  { %v5438_v13 = vld [vmem:[%s7072_s1 + $0x764] ss:$24 sps:$4 sm:$0xff]   ;;  %v5436_v14 = vld [vmem:[%s7072_s1 + $0x760] ss:$24 sps:$4 sm:$0xff]   ;;  %v5477_v18 = vld [vmem:[%s7074_s3 + $0x2c8] sm:$0xff]   ;;  %vm4023_vm0 = vcmask 254976  }
 0x136   :  { %v5473_v15 = vld [vmem:[%s7074_s3 + $0x2c0] sm:$0xff]   ;;  %v5635_v19 = vld [vmem:[%s7071_s0 + $0x10] ss:$0 sps:$4 sm:$0xff]   ;;  %v5478_v20 = vld [vmem:[%s7074_s3 + $0x288] sm:$0xff]   ;;  %v6528_v26 = vshrl.u32 %v267_v25, 7 }
 0x137   :  { %1854 = vmatpush1.bf16.msra.mxu0 %v5430_v9  ;;  %v5474_v16 = vld [vmem:[%s7074_s3 + $0x280] sm:$0xff]   ;;  %v5481_v21 = vld [vmem:[%s7074_s3 + $0x2d0] sm:$0xff]   ;;  %v5485_v23 = vld [vmem:[%s7074_s3 + $0x2d8] sm:$0xff]  }
 0x138   :  { %1855 = vmatprep.subr.bf16.mxu0 %v5435_v10  ;;  %v5482_v22 = vld [vmem:[%s7074_s3 + $0x290] sm:$0xff]   ;;  %v5486_v24 = vld [vmem:[%s7074_s3 + $0x298] sm:$0xff]   ;;  %v269_v27 = vsub.s32 0, %v6528_v26  ;;  %v6534_v28 = vld [vmem:[%s7073_s2] sm:$0x3f]  ;;  %v273_v29 = vsub.s32 1, %v6528_v26 }
 0x139   :  { %v277_v37 = vsub.s32 2, %v6528_v26  ;;  %v281_v38 = vsub.s32 3, %v6528_v26  ;;  %v5456_v45 = vld [vmem:[%s7074_s3 + $0x80] sm:$0xff]   ;;  %v5457_v49 = vld [vmem:[%s7074_s3 + $0xc8] sm:$0xff]   ;;  %v5459_v53 = vld [vmem:[%s7074_s3 + $0xd0] sm:$0xff]  }
 0x13a   :  { %v270_v30 = vrot.slane %v6534_v28, %v269_v27  ;;  %v274_v31 = vrot.slane %v6534_v28, %v273_v29  ;;  %v5458_v52 = vld [vmem:[%s7074_s3 + $0x88] sm:$0xff]   ;;  %v5460_v54 = vld [vmem:[%s7074_s3 + $0x90] sm:$0xff]   ;;  %v5461_v55 = vld [vmem:[%s7074_s3 + $0xd8] sm:$0xff]  }
 0x13b   :  { %1856 = vmatpush1.bf16.msra.mxu0 %v5433_v11  ;;  %v278_v39 = vrot.slane %v6534_v28, %v277_v37  ;;  %v282_v40 = vrot.slane %v6534_v28, %v281_v38  ;;  %v5462_v58 = vld [vmem:[%s7074_s3 + $0x98] sm:$0xff]   ;;  %v5463_v59 = vld [vmem:[%s7074_s3 + $0xe0] sm:$0xff]   ;;  %v5465_v61 = vld [vmem:[%s7074_s3 + $0xe8] sm:$0xff]  }
 0x13c   :  { %1857 = vmatprep.subr.bf16.mxu0 %v5438_v13  ;;  %v5464_v60 = vld [vmem:[%s7074_s3 + $0xa0] sm:$0xff]   ;;  %v5466_v0 = vld [vmem:[%s7074_s3 + $0xa8] sm:$0xff]   ;;  %v5467_v2 = vld [vmem:[%s7074_s3 + $0xf0] sm:$0xff]  }
 0x13d   :  { %v5489_v62 = vld [vmem:[%s7074_s3 + $0x2e0] sm:$0xff]   ;;  %v5493_v4 = vld [vmem:[%s7074_s3 + $0x2e8] sm:$0xff]   ;;  %v5468_v5 = vld [vmem:[%s7074_s3 + $0xb0] sm:$0xff]  }
 0x13e   :  { %v5490_v1 = vld [vmem:[%s7074_s3 + $0x2a0] sm:$0xff]   ;;  %v5494_v6 = vld [vmem:[%s7074_s3 + $0x2a8] sm:$0xff]   ;;  %v5469_v3 = vld [vmem:[%s7074_s3 + $0xf8] sm:$0xff]  }
 0x13f   :  { %1858 = vmatpush1.bf16.msra.mxu0 %v5436_v14  ;;  %v5497_v12 = vld [vmem:[%s7074_s3 + $0x2f0] sm:$0xff]   ;;  %v5501_v8 = vld [vmem:[%s7074_s3 + $0x2f8] sm:$0xff]   ;;  %v5471_v11 = vld [vmem:[%s7074_s3 + $0x140] sm:$0xff]  }
 0x140   :  { %4888 = vmatprep.subr.bf16.mxu0 %v5473_v15  ;;  %v5498_v7 = vld [vmem:[%s7074_s3 + $0x2b0] sm:$0xff]   ;;  %v5470_v9 = vld [vmem:[%s7074_s3 + $0xb8] sm:$0xff]   ;;  %v5472_v15 = vld [vmem:[%s7074_s3 + $0x100] sm:$0xff]  }
 0x141   :  { %v5502_v13 = vld [vmem:[%s7074_s3 + $0x2b8] sm:$0xff]   ;;  %v5488_v25 = vld [vmem:[%s7074_s3 + $0x120] sm:$0xff]   ;;  %v5491_v27 = vld [vmem:[%s7074_s3 + $0x168] sm:$0xff]  }
 0x142   :  { %1876 = vmatmul.mubr.bf16.vlgmr.msra.gmra.mrb[4].mxu0 %v5635_v19  ;;  %v5476_v19 = vld [vmem:[%s7074_s3 + $0x108] sm:$0xff]  }
 0x143   :  { %4889 = vmatpush3.bf16.msra.mxu0 %v5474_v16  ;;  %v5475_v16 = vld [vmem:[%s7074_s3 + $0x148] sm:$0xff]  }
 0x144   :  { %4890 = vmatprep.subr.bf16.mxu0 %v5477_v18  ;;  %v5505_v18 = vld [vmem:[%s7074_s3 + $0x3c0] sm:$0xff]   ;;  %v5492_v29 = vld [vmem:[%s7074_s3 + $0x128] sm:$0xff]  }
 0x147   :  { %4891 = vmatpush3.bf16.msra.mxu0 %v5478_v20  ;;  %v5479_v20 = vld [vmem:[%s7074_s3 + $0x150] sm:$0xff]  }
 0x148   :  { %4892 = vmatprep.subr.bf16.mxu0 %v5481_v21  ;;  %v5480_v21 = vld [vmem:[%s7074_s3 + $0x110] sm:$0xff]  }
 0x14b   :  { %4893 = vmatpush3.bf16.msra.mxu0 %v5482_v22  ;;  %v5483_v22 = vld [vmem:[%s7074_s3 + $0x158] sm:$0xff]  }
 0x14c   :  { %4894 = vmatprep.subr.bf16.mxu0 %v5485_v23  ;;  %v5484_v23 = vld [vmem:[%s7074_s3 + $0x118] sm:$0xff]  }
 0x14f   :  { %4895 = vmatpush3.bf16.msra.mxu0 %v5486_v24  ;;  %v5487_v24 = vld [vmem:[%s7074_s3 + $0x160] sm:$0xff]  }
 0x150   :  { %4896 = vmatprep.subr.bf16.mxu0 %v5489_v62  ;;  %v5511_v62 = vld [vmem:[%s7074_s3 + $0x1d0] sm:$0xff]  }
 0x153   :  { %4897 = vmatpush3.bf16.msra.mxu0 %v5490_v1  ;;  %v5512_v1 = vld [vmem:[%s7074_s3 + $0x190] sm:$0xff]  }
 0x154   :  { %4898 = vmatprep.subr.bf16.mxu0 %v5493_v4  ;;  %v5515_v4 = vld [vmem:[%s7074_s3 + $0x1d8] sm:$0xff]  }
 0x157   :  { %4899 = vmatpush3.bf16.msra.mxu0 %v5494_v6  ;;  %v5516_v6 = vld [vmem:[%s7074_s3 + $0x198] sm:$0xff]  }
 0x158   :  { %4900 = vmatprep.subr.bf16.mxu0 %v5497_v12  ;;  %v5519_v12 = vld [vmem:[%s7074_s3 + $0x1e0] sm:$0xff]  }
 0x15b   :  { %4901 = vmatpush3.bf16.msra.mxu0 %v5498_v7  ;;  %v5518_v7 = vld [vmem:[%s7074_s3 + $0x398] sm:$0xff]  }
 0x15c   :  { %4902 = vmatprep.subr.bf16.mxu0 %v5501_v8  ;;  %v5520_v8 = vld [vmem:[%s7074_s3 + $0x1a0] sm:$0xff]  }
 0x15f   :  { %4903 = vmatpush3.bf16.msra.mxu0 %v5502_v13  ;;  %v5524_v13 = vld [vmem:[%s7074_s3 + $0x1a8] sm:$0xff]  }
 0x160   :  { %4932 = vmatprep.subr.bf16.mxu0 %v5505_v18  ;;  %v5528_v18 = vld [vmem:[%s7074_s3 + $0x1b0] sm:$0xff]  }
 0x175   :  { %v1631_v63 = vpop.f32.mrb[0].mxu0 }
 0x176   :  { %v5042_v32 = vadd.f32 %v1631_v63, %v270_v30  ;;  %v1633_v17 = vpop.f32.mrb[1].mxu0  ;;  %v5495_v30 = vld [vmem:[%s7074_s3 + $0x170] sm:$0xff]   ;;  %v5499_v63 = vld [vmem:[%s7074_s3 + $0x178] sm:$0xff]  }
 0x177   :  { %v5043_v33 = vadd.f32 %v1633_v17, %v274_v31  ;;  %v1635_v34 = vpop.f32.mrb[2].mxu0  ;;  %v5496_v31 = vld [vmem:[%s7074_s3 + $0x130] sm:$0xff]   ;;  %v5503_v17 = vld [vmem:[%s7074_s3 + $0x1c0] sm:$0xff]  }
 0x178   :  { %1884 = vst [vmem:[#allocation2] sm:$0xff] %v5042_v32  ;;  %v1636_v36 = vpop.f32.mrb[3].mxu0  ;;  %v1754_v43 = vpop.f32.mrb[0].mxu1  ;;  %v5500_v32 = vld [vmem:[%s7074_s3 + $0x138] sm:$0xff]   ;;  %v289_v34 = vsub.s32 5, %v6528_v26 }
 0x179   :  { %1885 = vst [vmem:[#allocation2 + $0x8] sm:$0xff] %v5043_v33  ;;  %v5044_v46 = vadd.f32 %v1754_v43, %v278_v39  ;;  %v1756_v47 = vpop.f32.mrb[1].mxu1  ;;  %v285_v33 = vsub.s32 4, %v6528_v26 }
 0x17a   :  { %v5045_v50 = vadd.f32 %v1756_v47, %v282_v40  ;;  %v1758_v51 = vpop.f32.mrb[2].mxu1  ;;  %v290_v37 = vrot.slane %v6534_v28, %v289_v34 }
 0x17b   :  { %1886 = vst [vmem:[#allocation2 + $0x10] sm:$0xff] %v5044_v46  ;;  %v1759_v35 = vpop.f32.mrb[3].mxu1  ;;  %v286_v36 = vrot.slane %v6534_v28, %v285_v33  ;;  %v5504_v28 = vld [vmem:[%s7074_s3 + $0x180] sm:$0xff]  }
 0x17c   :  { %1887 = vst [vmem:[#allocation2 + $0x18] sm:$0xff] %v5045_v50 }
 0x17f   :  { %v1897_v41 = vld [vmem:[#allocation2] sm:$0x3] }
 0x180   :  { %v1898_v42 = vld [vmem:[#allocation2 + $0x8] sm:$0x3]  ;;  %v1903_v48 = vpack.c.bf16 %v1897_v41, %v1897_v41 }
 0x181   :  { %v1904_v44 = vpack.c.bf16 %v1898_v42, %v1898_v42 }
 0x182   :  { %v1899_v10 = vld [vmem:[#allocation2 + $0x10] sm:$0x3] }
 0x183   :  { %2325 = vmatprep.mubr.bf16.mxu1 %v1904_v44  ;;  %v1900_v56 = vld [vmem:[#allocation2 + $0x18] sm:$0x3]  ;;  %v1905_v14 = vpack.c.bf16 %v1899_v10, %v1899_v10  ;;  %v2415_v44 = vld [vmem:[#allocation2 + $0x8] sm:$0xc] }
 0x184   :  { %2326 = vmatmul.mubr.bf16.vlgmr.msra.gmra.mrb[4].mxu1 %v1903_v48  ;;  %v1906_v57 = vpack.c.bf16 %v1900_v56, %v1900_v56  ;;  %v2421_v46 = vpack.c.bf16 %v2415_v44, %v2415_v44  ;;  %v2953_v48 = vld [vmem:[#allocation2 + $0x18] sm:$0x30]  ;;  %v5523_v10 = vld [vmem:[%s7074_s3 + $0x1e8] sm:$0xff]  }
 0x185   :  { %4801 = vmatpush3.bf16.msra.mxu1 %v5456_v45 }
 0x186   :  { %4802 = vmatprep.subr.bf16.mxu1 %v5457_v49  ;;  %2365 = vmatprep.mubr.bf16.mxu1 %v1906_v57  ;;  %v5506_v57 = vld [vmem:[%s7074_s3 + $0x380] sm:$0xff]  }
 0x189   :  { %4803 = vmatpush3.bf16.msra.mxu1 %v5458_v52 }
 0x18a   :  { %4804 = vmatprep.subr.bf16.mxu1 %v5459_v53  ;;  %v5507_v53 = vld [vmem:[%s7074_s3 + $0x1c8] sm:$0xff]  }
 0x18d   :  { %4805 = vmatpush3.bf16.msra.mxu1 %v5460_v54  ;;  %v2959_v54 = vpack.c.bf16 %v2953_v48, %v2953_v48  ;;  %v5545_v48 = vld [vmem:[%s7074_s3 + $0x4d0] sm:$0xff]  }
 0x18e   :  { %4806 = vmatprep.subr.bf16.mxu1 %v5461_v55  ;;  %v2530_v55 = vrot.slane %v2421_v46, 1  ;;  %v5542_v46 = vld [vmem:[%s7074_s3 + $0x488] sm:$0xff]  }
 0x191   :  { %4807 = vmatpush3.bf16.msra.mxu1 %v5462_v58 }
 0x192   :  { %4808 = vmatprep.subr.bf16.mxu1 %v5463_v59  ;;  %v5508_v59 = vld [vmem:[%s7074_s3 + $0x188] sm:$0xff]  }
 0x195   :  { %4809 = vmatpush3.bf16.msra.mxu1 %v5464_v60  ;;  %v5509_v60 = vld [vmem:[%s7074_s3 + $0x3c8] sm:$0xff]  }
 0x196   :  { %4810 = vmatprep.subr.bf16.mxu1 %v5465_v61  ;;  %v3068_v61 = vrot.slane %v2959_v54, 2  ;;  %v5555_v54 = vld [vmem:[%s7074_s3 + $0x268] sm:$0xff]  }
 0x199   :  { %4811 = vmatpush3.bf16.msra.mxu1 %v5466_v0  ;;  %v5510_v0 = vld [vmem:[%s7074_s3 + $0x388] sm:$0xff]  }
 0x19a   :  { %4812 = vmatprep.subr.bf16.mxu1 %v5467_v2  ;;  %v5513_v2 = vld [vmem:[%s7074_s3 + $0x3d0] sm:$0xff]  }
 0x19d   :  { %4813 = vmatpush3.bf16.msra.mxu1 %v5468_v5  ;;  %v5514_v5 = vld [vmem:[%s7074_s3 + $0x390] sm:$0xff]  }
 0x19e   :  { %4814 = vmatprep.subr.bf16.mxu1 %v5469_v3  ;;  %v5517_v3 = vld [vmem:[%s7074_s3 + $0x3d8] sm:$0xff]  }
 0x1a1   :  { %4815 = vmatpush3.bf16.msra.mxu1 %v5470_v9  ;;  %v5521_v9 = vld [vmem:[%s7074_s3 + $0x3e0] sm:$0xff]  }
 0x1a2   :  { %4822 = vmatprep.subr.bf16.mxu1 %v5471_v11  ;;  %v5522_v11 = vld [vmem:[%s7074_s3 + $0x3a0] sm:$0xff]  }
 0x1a4   :  { %2366 = vmatmul.mubr.bf16.vlgmr.msra.gmra.mrb[8].mxu1 %v1905_v14  ;;  %v5525_v14 = vld [vmem:[%s7074_s3 + $0x3e8] sm:$0xff]  }
 0x1a5   :  { %4823 = vmatpush3.bf16.msra.mxu1 %v5472_v15  ;;  %v5527_v15 = vld [vmem:[%s7074_s3 + $0x1f0] sm:$0xff]  }
 0x1a6   :  { %4824 = vmatprep.subr.bf16.mxu1 %v5475_v16  ;;  %v5526_v16 = vld [vmem:[%s7074_s3 + $0x3a8] sm:$0xff]  }
 0x1a9   :  { %4825 = vmatpush3.bf16.msra.mxu1 %v5476_v19  ;;  %v5529_v19 = vld [vmem:[%s7074_s3 + $0x3f0] sm:$0xff]  }
 0x1aa   :  { %4826 = vmatprep.subr.bf16.mxu1 %v5479_v20  ;;  %v5531_v20 = vld [vmem:[%s7074_s3 + $0x1f8] sm:$0xff]  }
 0x1ad   :  { %4827 = vmatpush3.bf16.msra.mxu1 %v5480_v21  ;;  %v2414_v21 = vld [vmem:[#allocation2] sm:$0xc] }
 0x1ae   :  { %4828 = vmatprep.subr.bf16.mxu1 %v5483_v22  ;;  %v5530_v22 = vld [vmem:[%s7074_s3 + $0x3b0] sm:$0xff]  }
 0x1b1   :  { %4829 = vmatpush3.bf16.msra.mxu1 %v5484_v23  ;;  %v2417_v23 = vld [vmem:[#allocation2 + $0x18] sm:$0xc] }
 0x1b2   :  { %4830 = vmatprep.subr.bf16.mxu1 %v5487_v24  ;;  %v5532_v24 = vld [vmem:[%s7074_s3 + $0x1b8] sm:$0xff]  }
 0x1b5   :  { %4831 = vmatpush3.bf16.msra.mxu1 %v5488_v25  ;;  %v5533_v25 = vld [vmem:[%s7074_s3 + $0x3f8] sm:$0xff]  }
 0x1b6   :  { %4832 = vmatprep.subr.bf16.mxu1 %v5491_v27  ;;  %v2420_v27 = vpack.c.bf16 %v2414_v21, %v2414_v21 }
 0x1b8   :  { %v2529_v34 = vrot.slane %v2420_v27, 1  ;;  %v5572_v27 = vld [vmem:[%s7074_s3 + $0x308] sm:$0xff]  }
 0x1b9   :  { %4833 = vmatpush3.bf16.msra.mxu1 %v5492_v29  ;;  %v5535_v29 = vld [vmem:[%s7074_s3 + $0x240] sm:$0xff]  }
 0x1ba   :  { %4834 = vmatprep.subr.bf16.mxu1 %v5495_v30  ;;  %v2952_v30 = vld [vmem:[#allocation2 + $0x10] sm:$0x30] }
 0x1bb   :  { %v2958_v33 = vpack.c.bf16 %v2952_v30, %v2952_v30 }
 0x1bd   :  { %4835 = vmatpush3.bf16.msra.mxu1 %v5496_v31  ;;  %v2423_v31 = vpack.c.bf16 %v2417_v23, %v2417_v23 }
 0x1be   :  { %4836 = vmatprep.subr.bf16.mxu1 %v5499_v63  ;;  %v3487_v63 = vld [vmem:[#allocation2 + $0x8] sm:$0xc0] }
 0x1c1   :  { %4837 = vmatpush3.bf16.msra.mxu1 %v5500_v32  ;;  %v5534_v32 = vld [vmem:[%s7074_s3 + $0x3b8] sm:$0xff]  }
 0x1c2   :  { %4844 = vmatprep.subr.bf16.mxu1 %v5503_v17  ;;  %v5536_v17 = vld [vmem:[%s7074_s3 + $0x200] sm:$0xff]  }
 0x215   :  { %v1877_v38 = vpop.f32.mrb[4].mxu0 }
 0x216   :  { %v5046_v39 = vadd.f32 %v1877_v38, %v286_v36  ;;  %v1879_v40 = vpop.f32.mrb[5].mxu0  ;;  %v5537_v36 = vld [vmem:[%s7074_s3 + $0x4c0] sm:$0xff]   ;;  %v5539_v38 = vld [vmem:[%s7074_s3 + $0x248] sm:$0xff]  }
 0x217   :  { %v5047_v41 = vadd.f32 %v1879_v40, %v290_v37  ;;  %v1881_v42 = vpop.f32.mrb[6].mxu0  ;;  %v3493_v37 = vpack.c.bf16 %v3487_v63, %v3487_v63  ;;  %v5538_v40 = vld [vmem:[%s7074_s3 + $0x480] sm:$0xff]   ;;  %v5574_v63 = vld [vmem:[%s7074_s3 + $0x588] sm:$0xff]  }
 0x218   :  { %1888 = vst [vmem:[#allocation2 + $0x20] sm:$0xff] %v5046_v39  ;;  %v1882_v43 = vpop.f32.mrb[7].mxu0  ;;  %v2532_v39 = vrot.slane %v2423_v31, 1  ;;  %v5540_v42 = vld [vmem:[%s7074_s3 + $0x208] sm:$0xff]   ;;  %v5575_v31 = vld [vmem:[%s7074_s3 + $0x350] sm:$0xff]  }
 0x219   :  { %1889 = vst [vmem:[#allocation2 + $0x28] sm:$0xff] %v5047_v41  ;;  %v3067_v41 = vrot.slane %v2958_v33, 2  ;;  %v5541_v43 = vld [vmem:[%s7074_s3 + $0x4c8] sm:$0xff]   ;;  %v3602_v44 = vrot.slane %v3493_v37, 3  ;;  %v5579_v33 = vld [vmem:[%s7074_s3 + $0x358] sm:$0xff]  }
 0x21a   :  { %v5581_v37 = vld [vmem:[%s7074_s3 + $0x5d8] sm:$0xff]  }
 0x21f   :  { %v1901_v45 = vld [vmem:[#allocation2 + $0x20] sm:$0x3]  ;;  %v2418_v47 = vld [vmem:[#allocation2 + $0x20] sm:$0xc] }
 0x220   :  { %v1902_v49 = vld [vmem:[#allocation2 + $0x28] sm:$0x3]  ;;  %v2419_v50 = vld [vmem:[#allocation2 + $0x28] sm:$0xc]  ;;  %v2424_v35 = vpack.c.bf16 %v2418_v47, %v2418_v47  ;;  %v1907_v52 = vpack.c.bf16 %v1901_v45, %v1901_v45  ;;  %v5543_v45 = vld [vmem:[%s7074_s3 + $0x250] sm:$0xff]  }
 0x221   :  { %v1908_v26 = vpack.c.bf16 %v1902_v49, %v1902_v49  ;;  %v2425_v51 = vpack.c.bf16 %v2419_v50, %v2419_v50  ;;  %v5544_v47 = vld [vmem:[%s7074_s3 + $0x210] sm:$0xff]   ;;  %v5547_v49 = vld [vmem:[%s7074_s3 + $0x258] sm:$0xff]  }
 0x222   :  { %v2533_v58 = vrot.slane %v2424_v35, 1  ;;  %v5546_v50 = vld [vmem:[%s7074_s3 + $0x490] sm:$0xff]   ;;  %v5550_v35 = vld [vmem:[%s7074_s3 + $0x498] sm:$0xff]  }
 0x223   :  { %2405 = vmatprep.mubr.bf16.mxu1 %v1908_v26  ;;  %v2534_v56 = vrot.slane %v2425_v51, 1  ;;  %v5548_v26 = vld [vmem:[%s7074_s3 + $0x218] sm:$0xff]   ;;  %v5551_v51 = vld [vmem:[%s7074_s3 + $0x260] sm:$0xff]  }
 0x224   :  { %2406 = vmatmul.mubr.bf16.vlgmr.msra.gmra.mrb[12].mxu1 %v1907_v52  ;;  %v5552_v52 = vld [vmem:[%s7074_s3 + $0x220] sm:$0xff]  }
 0x225   :  { %4845 = vmatpush3.bf16.msra.mxu1 %v5504_v28  ;;  %2861 = vmatprep.mubr.bf16.mxu1 %v2530_v55  ;;  %v5549_v28 = vld [vmem:[%s7074_s3 + $0x4d8] sm:$0xff]   ;;  %v5554_v55 = vld [vmem:[%s7074_s3 + $0x4a0] sm:$0xff]  }
 0x226   :  { %2941 = vmatprep.mubr.bf16.mxu0 %v2534_v56  ;;  %4846 = vmatprep.subr.bf16.mxu1 %v5507_v53  ;;  %v5553_v53 = vld [vmem:[%s7074_s3 + $0x4e0] sm:$0xff]   ;;  %v5556_v56 = vld [vmem:[%s7074_s3 + $0x228] sm:$0xff]  }
 0x227   :  { %2942 = vmatmul.mubr.bf16.vlgmr.msra.gmra.mrb[8].mxu0 %v2533_v58  ;;  %v5559_v58 = vld [vmem:[%s7074_s3 + $0x270] sm:$0xff]  }
 0x228   :  { %4933 = vmatpush3.bf16.msra.mxu0 %v5506_v57  ;;  %3437 = vmatprep.mubr.bf16.mxu0 %v3068_v61  ;;  %v5557_v57 = vld [vmem:[%s7074_s3 + $0x4e8] sm:$0xff]  }
 0x229   :  { %4847 = vmatpush3.bf16.msra.mxu1 %v5508_v59  ;;  %4934 = vmatprep.subr.bf16.mxu0 %v5509_v60  ;;  %v5558_v61 = vld [vmem:[%s7074_s3 + $0x4a8] sm:$0xff]  }
 0x22a   :  { %4848 = vmatprep.subr.bf16.mxu1 %v5511_v62 }
 0x22c   :  { %4935 = vmatpush3.bf16.msra.mxu0 %v5510_v0 }
 0x22d   :  { %4849 = vmatpush3.bf16.msra.mxu1 %v5512_v1  ;;  %4936 = vmatprep.subr.bf16.mxu0 %v5513_v2  ;;  %v5560_v1 = vld [vmem:[%s7074_s3 + $0x230] sm:$0xff]  }
 0x22e   :  { %4850 = vmatprep.subr.bf16.mxu1 %v5515_v4  ;;  %v5561_v2 = vld [vmem:[%s7074_s3 + $0x4f0] sm:$0xff]  }
 0x230   :  { %4937 = vmatpush3.bf16.msra.mxu0 %v5514_v5  ;;  %v5563_v5 = vld [vmem:[%s7074_s3 + $0x278] sm:$0xff]  }
 0x231   :  { %4851 = vmatpush3.bf16.msra.mxu1 %v5516_v6  ;;  %4938 = vmatprep.subr.bf16.mxu0 %v5517_v3  ;;  %v2416_v6 = vld [vmem:[#allocation2 + $0x10] sm:$0xc] }
 0x232   :  { %4852 = vmatprep.subr.bf16.mxu1 %v5519_v12  ;;  %v5562_v3 = vld [vmem:[%s7074_s3 + $0x4b0] sm:$0xff]   ;;  %v2951_v12 = vld [vmem:[#allocation2 + $0x8] sm:$0x30] }
 0x234   :  { %4939 = vmatpush3.bf16.msra.mxu0 %v5518_v7  ;;  %v5564_v7 = vld [vmem:[%s7074_s3 + $0x238] sm:$0xff]  }
 0x235   :  { %4853 = vmatpush3.bf16.msra.mxu1 %v5520_v8  ;;  %4940 = vmatprep.subr.bf16.mxu0 %v5521_v9  ;;  %v5565_v8 = vld [vmem:[%s7074_s3 + $0x4f8] sm:$0xff]   ;;  %v2422_v9 = vpack.c.bf16 %v2416_v6, %v2416_v6 }
 0x236   :  { %4854 = vmatprep.subr.bf16.mxu1 %v5523_v10  ;;  %v5567_v10 = vld [vmem:[%s7074_s3 + $0x340] sm:$0xff]  }
 0x238   :  { %4941 = vmatpush3.bf16.msra.mxu0 %v5522_v11  ;;  %v3486_v11 = vld [vmem:[#allocation2] sm:$0xc0] }
 0x239   :  { %4855 = vmatpush3.bf16.msra.mxu1 %v5524_v13  ;;  %4942 = vmatprep.subr.bf16.mxu0 %v5525_v14  ;;  %v2957_v13 = vpack.c.bf16 %v2951_v12, %v2951_v12  ;;  %v3491_v14 = vld [vmem:[#allocation2 + $0x28] sm:$0xc0] }
 0x23a   :  { %4856 = vmatprep.subr.bf16.mxu1 %v5527_v15  ;;  %v5566_v15 = vld [vmem:[%s7074_s3 + $0x4b8] sm:$0xff]   ;;  %v3497_v21 = vpack.c.bf16 %v3491_v14, %v3491_v14  ;;  %v5602_v12 = vld [vmem:[%s7074_s3 + $0x408] sm:$0xff]  }
 0x23b   :  { %v3066_v23 = vrot.slane %v2957_v13, 2  ;;  %v5608_v13 = vld [vmem:[%s7074_s3 + $0x420] sm:$0xff]   ;;  %v5609_v14 = vld [vmem:[%s7074_s3 + $0x468] sm:$0xff]  }
 0x23c   :  { %4943 = vmatpush3.bf16.msra.mxu0 %v5526_v16  ;;  %v5568_v16 = vld [vmem:[%s7074_s3 + $0x300] sm:$0xff]   ;;  %v3606_v30 = vrot.slane %v3497_v21, 3  ;;  %v3489_v21 = vld [vmem:[#allocation2 + $0x18] sm:$0xc0] }
 0x23d   :  { %4857 = vmatpush3.bf16.msra.mxu1 %v5528_v18  ;;  %4944 = vmatprep.subr.bf16.mxu0 %v5529_v19  ;;  %v3492_v18 = vpack.c.bf16 %v3486_v11, %v3486_v11  ;;  %v2531_v19 = vrot.slane %v2422_v9, 1  ;;  %v5605_v9 = vld [vmem:[%s7074_s3 + $0x458] sm:$0xff]   ;;  %v5607_v11 = vld [vmem:[%s7074_s3 + $0x460] sm:$0xff]  }
 0x23e   :  { %4858 = vmatprep.subr.bf16.mxu1 %v5531_v20  ;;  %v5569_v20 = vld [vmem:[%s7074_s3 + $0x5c0] sm:$0xff]  }
 0x240   :  { %4945 = vmatpush3.bf16.msra.mxu0 %v5530_v22  ;;  %v5571_v22 = vld [vmem:[%s7074_s3 + $0x348] sm:$0xff]  }
 0x241   :  { %4859 = vmatpush3.bf16.msra.mxu1 %v5532_v24  ;;  %4946 = vmatprep.subr.bf16.mxu0 %v5533_v25  ;;  %v5570_v24 = vld [vmem:[%s7074_s3 + $0x580] sm:$0xff]   ;;  %v3601_v25 = vrot.slane %v3492_v18, 3  ;;  %v5612_v18 = vld [vmem:[%s7074_s3 + $0x430] sm:$0xff]  }
 0x242   :  { %4866 = vmatprep.subr.bf16.mxu1 %v5535_v29  ;;  %v5573_v29 = vld [vmem:[%s7074_s3 + $0x5c8] sm:$0xff]  }
 0x244   :  { %4947 = vmatpush3.bf16.msra.mxu0 %v5534_v32  ;;  %2862 = vmatmul.mubr.bf16.vlgmr.msra.gmra.mrb[16].mxu1 %v2529_v34  ;;  %v5576_v32 = vld [vmem:[%s7074_s3 + $0x310] sm:$0xff]  }
 0x245   :  { %4867 = vmatpush3.bf16.msra.mxu1 %v5536_v17  ;;  %2901 = vmatprep.mubr.bf16.mxu1 %v2532_v39  ;;  %v5577_v17 = vld [vmem:[%s7074_s3 + $0x5d0] sm:$0xff]   ;;  %v5582_v39 = vld [vmem:[%s7074_s3 + $0x598] sm:$0xff]  }
 0x246   :  { %4976 = vmatprep.subr.bf16.mxu0 %v5537_v36  ;;  %4868 = vmatprep.subr.bf16.mxu1 %v5539_v38  ;;  %v5578_v34 = vld [vmem:[%s7074_s3 + $0x590] sm:$0xff]   ;;  %v5580_v36 = vld [vmem:[%s7074_s3 + $0x318] sm:$0xff]   ;;  %v5583_v38 = vld [vmem:[%s7074_s3 + $0x360] sm:$0xff]  }
 0x247   :  { %3438 = vmatmul.mubr.bf16.vlgmr.msra.gmra.mrb[12].mxu0 %v3067_v41  ;;  %v5585_v41 = vld [vmem:[%s7074_s3 + $0x5e0] sm:$0xff]  }
 0x248   :  { %4977 = vmatpush3.bf16.msra.mxu0 %v5538_v40  ;;  %3933 = vmatprep.mubr.bf16.mxu0 %v3602_v44  ;;  %v5584_v40 = vld [vmem:[%s7074_s3 + $0x320] sm:$0xff]   ;;  %v5588_v44 = vld [vmem:[%s7074_s3 + $0x328] sm:$0xff]  }
 0x249   :  { %4869 = vmatpush3.bf16.msra.mxu1 %v5540_v42  ;;  %4978 = vmatprep.subr.bf16.mxu0 %v5541_v43  ;;  %v5587_v42 = vld [vmem:[%s7074_s3 + $0x368] sm:$0xff]   ;;  %v5586_v43 = vld [vmem:[%s7074_s3 + $0x5a0] sm:$0xff]  }
 0x24a   :  { %4870 = vmatprep.subr.bf16.mxu1 %v5543_v45  ;;  %v5589_v45 = vld [vmem:[%s7074_s3 + $0x5e8] sm:$0xff]  }
 0x24c   :  { %4979 = vmatpush3.bf16.msra.mxu0 %v5542_v46  ;;  %v5591_v46 = vld [vmem:[%s7074_s3 + $0x370] sm:$0xff]  }
 0x24d   :  { %4871 = vmatpush3.bf16.msra.mxu1 %v5544_v47  ;;  %4980 = vmatprep.subr.bf16.mxu0 %v5545_v48 }
 0x24e   :  { %4872 = vmatprep.subr.bf16.mxu1 %v5547_v49  ;;  %v5590_v49 = vld [vmem:[%s7074_s3 + $0x5a8] sm:$0xff]  }
 0x250   :  { %4981 = vmatpush3.bf16.msra.mxu0 %v5546_v50 }
 0x251   :  { %4873 = vmatpush3.bf16.msra.mxu1 %v5548_v26  ;;  %4982 = vmatprep.subr.bf16.mxu0 %v5549_v28  ;;  %v5592_v28 = vld [vmem:[%s7074_s3 + $0x330] sm:$0xff]  }
 0x252   :  { %4874 = vmatprep.subr.bf16.mxu1 %v5551_v51  ;;  %v5593_v51 = vld [vmem:[%s7074_s3 + $0x5f0] sm:$0xff]  }
 0x254   :  { %4983 = vmatpush3.bf16.msra.mxu0 %v5550_v35 }
 0x255   :  { %4875 = vmatpush3.bf16.msra.mxu1 %v5552_v52  ;;  %4984 = vmatprep.subr.bf16.mxu0 %v5553_v53  ;;  %v5595_v52 = vld [vmem:[%s7074_s3 + $0x378] sm:$0xff]  }
 0x256   :  { %4876 = vmatprep.subr.bf16.mxu1 %v5555_v54  ;;  %v2950_v54 = vld [vmem:[#allocation2] sm:$0x30] }
 0x257   :  { %v4794_v59 = vpop.f32.mrb[4].mxu1 }
 0x258   :  { %4985 = vmatpush3.bf16.msra.mxu0 %v5554_v55  ;;  %v4795_v60 = vpop.f32.mrb[5].mxu1  ;;  %v5594_v55 = vld [vmem:[%s7074_s3 + $0x5b0] sm:$0xff]  }
 0x259   :  { %v6835_v62 = vadd.f32 %v4795_v60, %v4794_v59  ;;  %4877 = vmatpush3.bf16.msra.mxu1 %v5556_v56  ;;  %v4797_v0 = vpop.f32.mrb[6].mxu1  ;;  %4986 = vmatprep.subr.bf16.mxu0 %v5557_v57  ;;  %v2955_v56 = vld [vmem:[#allocation2 + $0x28] sm:$0x30]  ;;  %v5596_v57 = vld [vmem:[%s7074_s3 + $0x338] sm:$0xff]   ;;  %v2956_v59 = vpack.c.bf16 %v2950_v54, %v2950_v54  ;;  %v5599_v60 = vld [vmem:[%s7074_s3 + $0x440] sm:$0xff]  }
 0x25a   :  { %v4798_v4 = vpop.f32.mrb[7].mxu1  ;;  %4878 = vmatprep.subr.bf16.mxu1 %v5559_v58  ;;  %v5597_v58 = vld [vmem:[%s7074_s3 + $0x5f8] sm:$0xff]  }
 0x25b   :  { %v5598_v0 = vld [vmem:[%s7074_s3 + $0x5b8] sm:$0xff]   ;;  %v3065_v4 = vrot.slane %v2956_v59, 2 }
 0x25c   :  { %4987 = vmatpush3.bf16.msra.mxu0 %v5558_v61  ;;  %v3490_v61 = vld [vmem:[#allocation2 + $0x20] sm:$0xc0] }
 0x25d   :  { %4879 = vmatpush3.bf16.msra.mxu1 %v5560_v1  ;;  %4988 = vmatprep.subr.bf16.mxu0 %v5561_v2  ;;  %v5600_v1 = vld [vmem:[%s7074_s3 + $0x400] sm:$0xff]   ;;  %v3496_v2 = vpack.c.bf16 %v3490_v61, %v3490_v61 }
 0x25e   :  { %4880 = vmatprep.subr.bf16.mxu1 %v5563_v5  ;;  %v5601_v5 = vld [vmem:[%s7074_s3 + $0x448] sm:$0xff]  }
 0x260   :  { %4989 = vmatpush3.bf16.msra.mxu0 %v5562_v3  ;;  %v3605_v3 = vrot.slane %v3496_v2, 3 }
 0x261   :  { %4881 = vmatpush3.bf16.msra.mxu1 %v5564_v7  ;;  %4990 = vmatprep.subr.bf16.mxu0 %v5565_v8  ;;  %v5603_v7 = vld [vmem:[%s7074_s3 + $0x450] sm:$0xff]  }
 0x262   :  { %4910 = vmatprep.subr.bf16.mxu1 %v5567_v10  ;;  %v5604_v8 = vld [vmem:[%s7074_s3 + $0x410] sm:$0xff]   ;;  %v5606_v10 = vld [vmem:[%s7074_s3 + $0x418] sm:$0xff]  }
 0x264   :  { %4991 = vmatpush3.bf16.msra.mxu0 %v5566_v15  ;;  %2902 = vmatmul.mubr.bf16.vlgmr.msra.gmra.mrb[20].mxu1 %v2531_v19  ;;  %v5610_v15 = vld [vmem:[%s7074_s3 + $0x428] sm:$0xff]   ;;  %v5613_v19 = vld [vmem:[%s7074_s3 + $0x478] sm:$0xff]  }
 0x265   :  { %4911 = vmatpush3.bf16.msra.mxu1 %v5568_v16  ;;  %3397 = vmatprep.mubr.bf16.mxu1 %v3066_v23  ;;  %v5611_v16 = vld [vmem:[%s7074_s3 + $0x470] sm:$0xff]  }
 0x266   :  { %5020 = vmatprep.subr.bf16.mxu0 %v5569_v20  ;;  %4912 = vmatprep.subr.bf16.mxu1 %v5571_v22  ;;  %v2954_v20 = vld [vmem:[#allocation2 + $0x20] sm:$0x30]  ;;  %v5614_v22 = vld [vmem:[%s7074_s3 + $0x438] sm:$0xff]  }
 0x267   :  { %3934 = vmatmul.mubr.bf16.vlgmr.msra.gmra.mrb[16].mxu0 %v3601_v25  ;;  %v2960_v23 = vpack.c.bf16 %v2954_v20, %v2954_v20  ;;  %v3495_v25 = vpack.c.bf16 %v3489_v21, %v3489_v21 }
 0x268   :  { %5021 = vmatpush3.bf16.msra.mxu0 %v5570_v24  ;;  %4013 = vmatprep.mubr.bf16.mxu0 %v3606_v30  ;;  %v5615_v24 = vld [vmem:[%s7074_s3 + $0x540] sm:$0xff]   ;;  %v5617_v30 = vld [vmem:[%s7074_s3 + $0x548] sm:$0xff]  }
 0x269   :  { %4913 = vmatpush3.bf16.msra.mxu1 %v5572_v27  ;;  %5022 = vmatprep.subr.bf16.mxu0 %v5573_v29  ;;  %v5616_v27 = vld [vmem:[%s7074_s3 + $0x500] sm:$0xff]   ;;  %v3069_v29 = vrot.slane %v2960_v23, 2 }
 0x26a   :  { %4914 = vmatprep.subr.bf16.mxu1 %v5575_v31  ;;  %v3604_v31 = vrot.slane %v3495_v25, 3 }
 0x26c   :  { %5023 = vmatpush3.bf16.msra.mxu0 %v5574_v63  ;;  %v5618_v63 = vld [vmem:[%s7074_s3 + $0x508] sm:$0xff]  }
 0x26d   :  { %4915 = vmatpush3.bf16.msra.mxu1 %v5576_v32  ;;  %5024 = vmatprep.subr.bf16.mxu0 %v5577_v17  ;;  %v5619_v32 = vld [vmem:[%s7074_s3 + $0x550] sm:$0xff]  }
 0x26e   :  { %4916 = vmatprep.subr.bf16.mxu1 %v5579_v33  ;;  %v5620_v17 = vld [vmem:[%s7074_s3 + $0x510] sm:$0xff]   ;;  %v5621_v33 = vld [vmem:[%s7074_s3 + $0x558] sm:$0xff]  }
 0x270   :  { %5025 = vmatpush3.bf16.msra.mxu0 %v5578_v34  ;;  %v5622_v34 = vld [vmem:[%s7074_s3 + $0x518] sm:$0xff]  }
 0x271   :  { %4917 = vmatpush3.bf16.msra.mxu1 %v5580_v36  ;;  %5026 = vmatprep.subr.bf16.mxu0 %v5581_v37  ;;  %v5623_v36 = vld [vmem:[%s7074_s3 + $0x560] sm:$0xff]  }
 0x272   :  { %4918 = vmatprep.subr.bf16.mxu1 %v5583_v38  ;;  %v5624_v37 = vld [vmem:[%s7074_s3 + $0x520] sm:$0xff]   ;;  %v5625_v38 = vld [vmem:[%s7074_s3 + $0x568] sm:$0xff]  }
 0x274   :  { %5027 = vmatpush3.bf16.msra.mxu0 %v5582_v39  ;;  %v5626_v39 = vld [vmem:[%s7074_s3 + $0x528] sm:$0xff]  }
 0x275   :  { %4919 = vmatpush3.bf16.msra.mxu1 %v5584_v40  ;;  %5028 = vmatprep.subr.bf16.mxu0 %v5585_v41  ;;  %v5627_v40 = vld [vmem:[%s7074_s3 + $0x570] sm:$0xff]  }
 0x276   :  { %4920 = vmatprep.subr.bf16.mxu1 %v5587_v42  ;;  %v5628_v41 = vld [vmem:[%s7074_s3 + $0x530] sm:$0xff]   ;;  %v5629_v42 = vld [vmem:[%s7074_s3 + $0x578] sm:$0xff]  }
 0x277   :  { %v4816_v47 = vpop.f32.mrb[8].mxu1 }
 0x278   :  { %5029 = vmatpush3.bf16.msra.mxu0 %v5586_v43  ;;  %v4817_v48 = vpop.f32.mrb[9].mxu1  ;;  %v3488_v43 = vld [vmem:[#allocation2 + $0x10] sm:$0xc0] }
 0x279   :  { %v4818_v50 = vadd.f32 %v4817_v48, %v4816_v47  ;;  %v4819_v26 = vpop.f32.mrb[10].mxu1  ;;  %4921 = vmatpush3.bf16.msra.mxu1 %v5588_v44  ;;  %5030 = vmatprep.subr.bf16.mxu0 %v5589_v45  ;;  %v5630_v44 = vld [vmem:[%s7074_s3 + $0x538] sm:$0xff]   ;;  %v3494_v45 = vpack.c.bf16 %v3488_v43, %v3488_v43 }
 0x27a   :  { %v4820_v35 = vpop.f32.mrb[11].mxu1  ;;  %4922 = vmatprep.subr.bf16.mxu1 %v5591_v46 }
 0x27b   :  { %v6943_v53 = vadd.f32 %v4818_v50, %v6835_v62  ;;  %v2961_v62 = vpack.c.bf16 %v2955_v56, %v2955_v56  ;;  %v3603_v46 = vrot.slane %v3494_v45, 3 }
 0x27c   :  { %5031 = vmatpush3.bf16.msra.mxu0 %v5590_v49 }
 0x27d   :  { %4923 = vmatpush3.bf16.msra.mxu1 %v5592_v28  ;;  %5032 = vmatprep.subr.bf16.mxu0 %v5593_v51  ;;  %v3070_v6 = vrot.slane %v2961_v62, 2 }
 0x27e   :  { %4924 = vmatprep.subr.bf16.mxu1 %v5595_v52 }
 0x280   :  { %5033 = vmatpush3.bf16.msra.mxu0 %v5594_v55 }
 0x281   :  { %4925 = vmatpush3.bf16.msra.mxu1 %v5596_v57  ;;  %5034 = vmatprep.subr.bf16.mxu0 %v5597_v58 }
 0x282   :  { %4954 = vmatprep.subr.bf16.mxu1 %v5599_v60 }
 0x284   :  { %5035 = vmatpush3.bf16.msra.mxu0 %v5598_v0  ;;  %3398 = vmatmul.mubr.bf16.vlgmr.msra.gmra.mrb[24].mxu1 %v3065_v4 }
 0x285   :  { %4955 = vmatpush3.bf16.msra.mxu1 %v5600_v1  ;;  %3477 = vmatprep.mubr.bf16.mxu1 %v3070_v6 }
 0x286   :  { %4956 = vmatprep.subr.bf16.mxu1 %v5601_v5 }
 0x287   :  { %4014 = vmatmul.mubr.bf16.vlgmr.msra.gmra.mrb[20].mxu0 %v3605_v3 }
 0x289   :  { %4957 = vmatpush3.bf16.msra.mxu1 %v5602_v12 }
 0x28a   :  { %4958 = vmatprep.subr.bf16.mxu1 %v5603_v7 }
 0x28d   :  { %4959 = vmatpush3.bf16.msra.mxu1 %v5604_v8 }
 0x28e   :  { %4960 = vmatprep.subr.bf16.mxu1 %v5605_v9 }
 0x291   :  { %4961 = vmatpush3.bf16.msra.mxu1 %v5606_v10 }
 0x292   :  { %4962 = vmatprep.subr.bf16.mxu1 %v5607_v11 }
 0x295   :  { %4963 = vmatpush3.bf16.msra.mxu1 %v5608_v13 }
 0x296   :  { %4964 = vmatprep.subr.bf16.mxu1 %v5609_v14 }
 0x299   :  { %4965 = vmatpush3.bf16.msra.mxu1 %v5610_v15 }
 0x29a   :  { %4966 = vmatprep.subr.bf16.mxu1 %v5611_v16 }
 0x29d   :  { %4967 = vmatpush3.bf16.msra.mxu1 %v5612_v18 }
 0x29e   :  { %4968 = vmatprep.subr.bf16.mxu1 %v5613_v19 }
 0x2a1   :  { %4969 = vmatpush3.bf16.msra.mxu1 %v5614_v22 }
 0x2a2   :  { %4998 = vmatprep.subr.bf16.mxu1 %v5615_v24 }
 0x2a4   :  { %3478 = vmatmul.mubr.bf16.vlgmr.msra.gmra.mrb[28].mxu1 %v3069_v29 }
 0x2a5   :  { %4999 = vmatpush3.bf16.msra.mxu1 %v5616_v27  ;;  %3973 = vmatprep.mubr.bf16.mxu1 %v3604_v31 }
 0x2a6   :  { %5000 = vmatprep.subr.bf16.mxu1 %v5617_v30 }
 0x2a9   :  { %5001 = vmatpush3.bf16.msra.mxu1 %v5618_v63 }
 0x2aa   :  { %5002 = vmatprep.subr.bf16.mxu1 %v5619_v32 }
 0x2ad   :  { %5003 = vmatpush3.bf16.msra.mxu1 %v5620_v17 }
 0x2ae   :  { %5004 = vmatprep.subr.bf16.mxu1 %v5621_v33 }
 0x2b1   :  { %5005 = vmatpush3.bf16.msra.mxu1 %v5622_v34 }
 0x2b2   :  { %5006 = vmatprep.subr.bf16.mxu1 %v5623_v36 }
 0x2b5   :  { %5007 = vmatpush3.bf16.msra.mxu1 %v5624_v37 }
 0x2b6   :  { %5008 = vmatprep.subr.bf16.mxu1 %v5625_v38 }
 0x2b9   :  { %5009 = vmatpush3.bf16.msra.mxu1 %v5626_v39 }
 0x2ba   :  { %5010 = vmatprep.subr.bf16.mxu1 %v5627_v40 }
 0x2bd   :  { %5011 = vmatpush3.bf16.msra.mxu1 %v5628_v41 }
 0x2be   :  { %5012 = vmatprep.subr.bf16.mxu1 %v5629_v42 }
 0x2c1   :  { %5013 = vmatpush3.bf16.msra.mxu1 %v5630_v44 }
 0x2c4   :  { %3974 = vmatmul.mubr.bf16.vlgmr.msra.gmra.mrb[32].mxu1 %v3603_v46 }
 0x2f7   :  { %v4838_v47 = vpop.f32.mrb[12].mxu1 }
 0x2f8   :  { %v4839_v48 = vpop.f32.mrb[13].mxu1 }
 0x2f9   :  { %v4840_v49 = vadd.f32 %v4839_v48, %v4838_v47  ;;  %v4841_v50 = vpop.f32.mrb[14].mxu1 }
 0x2fa   :  { %v4904_v26 = vpop.f32.mrb[8].mxu0  ;;  %v4842_v28 = vpop.f32.mrb[15].mxu1 }
 0x2fb   :  { %v2408_v51 = vadd.f32 %v4840_v49, %v6943_v53  ;;  %v4905_v35 = vpop.f32.mrb[9].mxu0  ;;  %v4297_v53 = vld [vmem:[%s7075_s4] ss:$0 sm:$0xff]  ;;  %s5661_s4 = smov [#allocation3]  }
 0x2fc   :  { %v4906_v52 = vadd.f32 %v4905_v35, %v4904_v26  ;;  %v4907_v54 = vpop.f32.mrb[10].mxu0  ;;  %s4044_s30 = sshll.u32 %s5661_s4, 4  ;;  %s4045_s30 = int_to_ptr.vmem [resolvable:$true] %s4044_s30 }
 0x2fd   :  { %v4908_v55 = vpop.f32.mrb[11].mxu0  ;;  %v2413_v13 = vadd.f32 %v4297_v53, %v2408_v51  ;;  %s5636_s2 = scalar_lea.vmem %s4045_s30, 32  ;;  %p5641_p1 = scmp.lt.s32.totalorder %s4045_s30, %s4045_s30 }
 0x2fe   :  { %p5637_p0 = scmp.ne.s32.totalorder %s4045_s30, %s5636_s2  ;;  %p5642_p2 = scmp.lt.s32.totalorder %s5636_s2, %s5636_s2 }
 0x300   :  { %p5643_p3 = por %p5642_p2, %p5641_p1 }
 0x302   :  { %p5644_p4 = pnand %p5643_p3, %p5637_p0 }
 0x317   :  { %v4860_v56 = vpop.f32.mrb[16].mxu1 }
 0x318   :  { %v4861_v57 = vpop.f32.mrb[17].mxu1 }
 0x319   :  { %v4862_v58 = vadd.f32 %v4861_v57, %v4860_v56  ;;  %v4863_v59 = vpop.f32.mrb[18].mxu1 }
 0x31a   :  { %v4948_v60 = vpop.f32.mrb[12].mxu0  ;;  %v4864_v61 = vpop.f32.mrb[19].mxu1 }
 0x31b   :  { %v4949_v62 = vpop.f32.mrb[13].mxu0 }
 0x31c   :  { %v4950_v0 = vadd.f32 %v4949_v62, %v4948_v60  ;;  %v4951_v1 = vpop.f32.mrb[14].mxu0 }
 0x31d   :  { %v4952_v2 = vpop.f32.mrb[15].mxu0 }
 0x337   :  { %v4882_v4 = vpop.f32.mrb[20].mxu1 }
 0x338   :  { %v4883_v5 = vpop.f32.mrb[21].mxu1 }
 0x339   :  { %v4884_v6 = vadd.f32 %v4883_v5, %v4882_v4  ;;  %v4885_v3 = vpop.f32.mrb[22].mxu1 }
 0x33a   :  { %v4992_v12 = vpop.f32.mrb[16].mxu0  ;;  %v4886_v7 = vpop.f32.mrb[23].mxu1 }
 0x33b   :  { %v2904_v8 = vadd.f32 %v4884_v6, %v4862_v58  ;;  %v4993_v9 = vpop.f32.mrb[17].mxu0 }
 0x33c   :  { %v4994_v10 = vadd.f32 %v4993_v9, %v4992_v12  ;;  %v4995_v11 = vpop.f32.mrb[18].mxu0 }
 0x33d   :  { %v2944_v14 = vadd.f32 %v4906_v52, %v2904_v8  ;;  %v4996_v15 = vpop.f32.mrb[19].mxu0 }
 0x33f   :  { %v2949_v16 = vadd.f32 %v2944_v14, %v2413_v13 }
 0x357   :  { %v4926_v18 = vpop.f32.mrb[24].mxu1 }
 0x358   :  { %v4927_v19 = vpop.f32.mrb[25].mxu1 }
 0x359   :  { %v4928_v20 = vadd.f32 %v4927_v19, %v4926_v18  ;;  %v4929_v21 = vpop.f32.mrb[26].mxu1 }
 0x35a   :  { %v5036_v22 = vpop.f32.mrb[20].mxu0  ;;  %v4930_v23 = vpop.f32.mrb[27].mxu1 }
 0x35b   :  { %v3440_v24 = vadd.f32 %v4950_v0, %v4928_v20  ;;  %v5037_v25 = vpop.f32.mrb[21].mxu0 }
 0x35c   :  { %v5038_v27 = vadd.f32 %v5037_v25, %v5036_v22  ;;  %v5039_v29 = vpop.f32.mrb[22].mxu0 }
 0x35d   :  { %v5040_v30 = vpop.f32.mrb[23].mxu0 }
 0x377   :  { %v4970_v31 = vpop.f32.mrb[28].mxu1 }
 0x378   :  { %v4971_v63 = vpop.f32.mrb[29].mxu1 }
 0x379   :  { %v4972_v32 = vadd.f32 %v4971_v63, %v4970_v31  ;;  %v4973_v17 = vpop.f32.mrb[30].mxu1 }
 0x37a   :  { %v4974_v33 = vpop.f32.mrb[31].mxu1 }
 0x37b   :  { %v3480_v34 = vadd.f32 %v4972_v32, %v3440_v24 }
 0x37d   :  { %v3485_v36 = vadd.f32 %v3480_v34, %v2949_v16 }
 0x397   :  { %v5014_v37 = vpop.f32.mrb[32].mxu1 }
 0x398   :  { %v5015_v38 = vpop.f32.mrb[33].mxu1 }
 0x399   :  { %v5016_v39 = vadd.f32 %v5015_v38, %v5014_v37  ;;  %v5017_v40 = vpop.f32.mrb[34].mxu1 }
 0x39a   :  { %v5018_v41 = vpop.f32.mrb[35].mxu1 }
 0x39b   :  { %v3976_v42 = vadd.f32 %v5016_v39, %v4994_v10 }
 0x39d   :  { %v4016_v43 = vadd.f32 %v5038_v27, %v3976_v42 }
 0x39f   :  { %v4021_v44 = vadd.f32 %v4016_v43, %v3485_v36 }
 0x3a1   :  { %v4022_v45 = vmul.f32 %v4021_v44, %v4021_v44 }
 0x3a3   :  { %v4024_v46 = vsel %vm4023_vm0, %v4022_v45, 0.0 }
 0x3a4   :  { %4025 = vadd.xlane.f32.xlu0 %v4024_v46 }
 0x431   :  { %v4026_v47 = vpop.xlane.xlu0 %4025 }
 0x432   :  { %5631 = vrsqrt.f32 %v4026_v47  ;;  %vm4029_vm1 = vcmp.eq.f32.partialorder %v4026_v47, inf  ;;  %v4032_v50 = vand.u32 2147483648, %v4026_v47  ;;  %vm4031_vm2 = vcmp.eq.f32.partialorder %v4026_v47, 0.0 }
 0x43c   :  { %v5632_v48 = vpop.eup %5631 }
 0x43d   :  { %v4028_v49 = vmul.f32 %v5632_v48, %v4026_v47 }
 0x43f   :  { %v4030_v26 = vsel %vm4029_vm1, %v4026_v47, %v4028_v49 }
 0x440   :  { %v4033_v28 = vsel %vm4031_vm2, %v4032_v50, %v4030_v26 }
 0x441   :  { %v4034_v51 = vmax.f32 %v4033_v28, 1e-12 }
 0x443   :  { %5633 = vrcp.f32 %v4034_v51 }
 0x44d   :  { %v5634_v35 = vpop.eup %5633 }
 0x44e   :  { %v4036_v52 = vmul.f32 %v5634_v35, %v4021_v44 }
 0x450   :  { %4037 = vst.msk [vmem:[#allocation3] sm:$0x3] %vm4023_vm0, %v4036_v52 }
 0x451   :  { %5647 = shalt.err (!%p5644_p4)
}
 0x452   :  { %s5648_s8 = scalar_lea.hbm %s7076_s5, 32 }
 0x453   :  { %p5649_p5 = scmp.ne.s32.totalorder %s7076_s5, %s5648_s8  ;;  %p5652_p6 = scmp.lt.u32.totalorder %s5648_s8, %s7076_s5 }
 0x455   :  { %p5654_p7 = pnand %p5652_p6, %p5649_p5 }
 0x457   :  { %5657 = shalt.err (!%p5654_p7)
}
 0x458   :  { %4047 = dma.vmem_to_hbm [thread:$0]  %s4045_s30, 32, %s7076_s5, [#allocation4]  }
 0x459   :  { %5658 = dma.done.wait [#allocation4], 32  }
 0x45a   :  { %5659 = vsyncadd [#allocation4], 4294967264 }
 0x45b   :  { %4051 = vsyncpa [#allocation4], 1 }

</bundles_post_ra>
